<compile_context>
chip_gen: v7x
topology: tpu7x:2x2x1
jax: 0.10.0
libtpu: 0.0.40
codegen_flags: <defaults>
</compile_context>

<pallas_src>
import numpy as np
import jax
import jax.numpy as jnp
from jax.experimental import pallas as pl
from jax.experimental.pallas import tpu as pltpu


def _time_scale_kernel(d_ref, start_ref, sig_ref, out_ref):
    # d_ref, start_ref: SMEM scalar-prefetch refs, shape (B,), int32
    # sig_ref/out_ref : VMEM (1, 1, L) float32 blocks (one signal per grid row)
    b = pl.program_id(0)
    L = sig_ref.shape[-1]
    D = d_ref[b]            # desired (virtual) resampled length, >= 1
    start = start_ref[b]    # crop offset (0 unless D > L)

    # Output lane index i and the source index j in the virtual length-D
    # resampled signal:
    #   D > L  -> crop:  j = start + i
    #   D <= L -> tile:  j = i mod D      (np.resize semantics)
    i = jax.lax.broadcasted_iota(jnp.int32, (1, L), 1)
    j_tile = jax.lax.rem(i, jnp.broadcast_to(D, (1, L)))    # exact integer mod
    j = jnp.where(D > L, start + i, j_tile)

    # Linear-interpolation position in the original signal (np.interp on
    # matching linspaces):  x = j * (L - 1) / (D - 1).  Single f32 division;
    # the numerator is an exact int32.
    denom = jnp.maximum(D - 1, 1).astype(jnp.float32)
    x = (j * (L - 1)).astype(jnp.float32) / denom
    x = jnp.minimum(x, jnp.float32(L - 1))                  # rounding safety

    # Fused gather + lerp as one tent-weight matrix:
    #   W[k, col] = max(0, 1 - |x[col] - k|)   ->   out = sig @ W
    k = jax.lax.broadcasted_iota(jnp.int32, (L, L), 0).astype(jnp.float32)
    w = jnp.maximum(1.0 - jnp.abs(x - k), 0.0)              # (L, L)

    sig = sig_ref[0]                                        # (1, L)
    out_ref[0] = jnp.dot(sig, w, preferred_element_type=jnp.float32)


def _time_scale_pallas(signals_3d, desired_lengths, starts):
    """signals_3d: (B, 1, L) f32; desired_lengths/starts: (B,) int32."""
    B, _, L = signals_3d.shape
    return pl.pallas_call(
        _time_scale_kernel,
        out_shape=jax.ShapeDtypeStruct((B, 1, L), jnp.float32),
        grid_spec=pltpu.PrefetchScalarGridSpec(
            num_scalar_prefetch=2,
            grid=(B,),
            in_specs=[pl.BlockSpec((1, 1, L), lambda b, d, s: (b, 0, 0))],
            out_specs=pl.BlockSpec((1, 1, L), lambda b, d, s: (b, 0, 0)),
        ),
        compiler_params=pltpu.CompilerParams(
            dimension_semantics=("parallel",)),
    )(desired_lengths, starts, signals_3d)


class RandomTimeScale:
    """JAX/Pallas port of the PyTorch RandomTimeScale augmentation."""

    def __init__(self, factor, p=0.5, seed=0):
        if not (isinstance(factor, (int, float)) and factor > 0):
            raise ValueError("factor must be a int or float greater than 0")
        if not (isinstance(p, (int, float)) and 0 <= p <= 1):
            raise ValueError("p must be a int or float between 0 and 1")
        self.factor = float(factor)
        self.p = float(p)
        # Deterministic host-side RNG for the augmentation parameters.
        self._rng = np.random.default_rng(seed)

    def _draw_params(self, L):
        """Host-side draw of (desired_length, start) for one sample."""
        if self._rng.random() >= self.p:
            return L, 0  # identity: D == L resampling is an exact passthrough
        u = self._rng.uniform(-self.factor, self.factor)
        D = max(int(L * (1.0 + u)), 1)
        start = int(self._rng.integers(0, D - L + 1)) if D > L else 0
        return D, start

    def __call__(self, signal):
        """Single 1-D signal (matches the nn.Module forward)."""
        sig = jnp.asarray(signal, dtype=jnp.float32).reshape(1, -1)
        return self.batched(sig)[0]

    def batched(self, signals):
        """(B, L) batch; independent draws per row, one fused pallas_call."""
        signals = jnp.asarray(signals, dtype=jnp.float32)
        B, L = signals.shape
        params = [self._draw_params(L) for _ in range(B)]
        d = jnp.array([p[0] for p in params], dtype=jnp.int32)
        s = jnp.array([p[1] for p in params], dtype=jnp.int32)
        out = _time_scale_pallas(signals.reshape(B, 1, L), d, s)
        return out.reshape(B, L)


def _numpy_reference(signal, desired_length, start):
    L = len(signal)
    res = np.interp(
        np.linspace(0.0, 1.0, desired_length),
        np.linspace(0.0, 1.0, L),
        np.asarray(signal, dtype=np.float64),
    )
    if desired_length > L:
        return res[start:start + L]
    return np.resize(res, L)


if __name__ == "__main__":
    key = jax.random.PRNGKey(0)
    B, L = 4, 256
    signals = jax.random.normal(key, (B, L), dtype=jnp.float32)
    sig_np = np.asarray(signals, dtype=np.float64)

    # --- Direct batched-kernel check against the numpy reference -----------
    # Rows cover: crop (D>L), the previously-failing exact-multiple tile
    # (D=220), a power-of-two tile (D=128), and identity (D==L).
    D_list = [320, 220, 128, 256]
    start_list = [17, 0, 0, 0]
    D = jnp.array(D_list, dtype=jnp.int32)
    start = jnp.array(start_list, dtype=jnp.int32)

    out = _time_scale_pallas(signals.reshape(B, 1, L), D, start)
    out = jax.block_until_ready(out).reshape(B, L)

    for b in range(B):
        ref = _numpy_reference(sig_np[b], D_list[b], start_list[b])
        np.testing.assert_allclose(
            np.asarray(out[b]), ref, rtol=1e-4, atol=5e-4)

    # --- Exercise the module-style single-signal path -----------------------
    aug = RandomTimeScale(factor=0.3, p=1.0, seed=0)
    out1 = jax.block_until_ready(aug(signals[0]))

    # Replay the deterministic host-side draws for the reference.
    rng = np.random.default_rng(0)
    _ = rng.random()
    u = rng.uniform(-0.3, 0.3)
    Dref = max(int(L * (1.0 + u)), 1)
    sref = int(rng.integers(0, Dref - L + 1)) if Dref > L else 0
    ref1 = _numpy_reference(sig_np[0], Dref, sref)
    np.testing.assert_allclose(np.asarray(out1), ref1, rtol=1e-4, atol=5e-4)

    assert out1.shape == (L,)
    print("KERNEL_OK")
</pallas_src>

<mosaic_0001>
module attributes {stable_mosaic.version = 11 : i64} {
  func.func @_time_scale_kernel(%arg0: i32, %arg1: memref<4xi32, #tpu.memory_space<smem>>, %arg2: memref<4xi32, #tpu.memory_space<smem>>, %arg3: memref<1x1x256xf32, #tpu.memory_space<vmem>>, %arg4: memref<1x1x256xf32, #tpu.memory_space<vmem>>) attributes {dimension_semantics = [#tpu.dimension_semantics<parallel>], iteration_bounds = array<i64: 4>, scalar_prefetch = 2 : i64, scratch_operands = 0 : i64, tpu.core_type = #tpu.core_type<tc>, window_params = [{transform_indices = @transform_0, window_bounds = array<i64: 1, 1, 256>}, {transform_indices = @transform_1, window_bounds = array<i64: 1, 1, 256>}]} {
    %0 = arith.index_cast %arg0 : i32 to index
    %1 = memref.load %arg1[%0] : memref<4xi32, #tpu.memory_space<smem>>
    %2 = arith.index_cast %arg0 : i32 to index
    %3 = memref.load %arg2[%2] : memref<4xi32, #tpu.memory_space<smem>>
    %4 = tpu.iota {dimensions = array<i32: 1>} : vector<1x256xi32>
    %5 = vector.broadcast %1 : i32 to vector<1x256xi32>
    %6 = arith.remsi %4, %5 : vector<1x256xi32>
    %c256_i32 = arith.constant 256 : i32
    %7 = arith.cmpi sgt, %1, %c256_i32 : i32
    %8 = vector.broadcast %3 : i32 to vector<1x256xi32>
    %9 = arith.addi %8, %4 : vector<1x256xi32>
    %10 = arith.select %7, %9, %6 : vector<1x256xi32>
    %c1_i32 = arith.constant 1 : i32
    %11 = arith.subi %1, %c1_i32 : i32
    %c1_i32_0 = arith.constant 1 : i32
    %12 = arith.maxsi %11, %c1_i32_0 : i32
    %13 = arith.sitofp %12 : i32 to f32
    %c255_i32 = arith.constant 255 : i32
    %14 = vector.broadcast %c255_i32 : i32 to vector<1x256xi32>
    %15 = arith.muli %10, %14 : vector<1x256xi32>
    %16 = arith.sitofp %15 : vector<1x256xi32> to vector<1x256xf32>
    %17 = vector.broadcast %13 : f32 to vector<1x256xf32>
    %18 = arith.divf %16, %17 : vector<1x256xf32>
    %cst = arith.constant 2.550000e+02 : f32
    %19 = vector.broadcast %cst : f32 to vector<1x256xf32>
    %20 = arith.minimumf %18, %19 : vector<1x256xf32>
    %21 = tpu.iota {dimensions = array<i32: 0>} : vector<256x256xi32>
    %22 = arith.sitofp %21 : vector<256x256xi32> to vector<256x256xf32>
    %23 = vector.broadcast %20 : vector<1x256xf32> to vector<256x256xf32>
    %24 = arith.subf %23, %22 : vector<256x256xf32>
    %25 = math.absf %24 : vector<256x256xf32>
    %cst_1 = arith.constant 1.000000e+00 : f32
    %26 = vector.broadcast %cst_1 : f32 to vector<256x256xf32>
    %27 = arith.subf %26, %25 : vector<256x256xf32>
    %cst_2 = arith.constant 0.000000e+00 : f32
    %28 = vector.broadcast %cst_2 : f32 to vector<256x256xf32>
    %29 = arith.maximumf %27, %28 : vector<256x256xf32>
    %c0 = arith.constant 0 : index
    %c0_3 = arith.constant 0 : index
    %c0_4 = arith.constant 0 : index
    %30 = vector.load %arg3[%c0, %c0_3, %c0_4] : memref<1x1x256xf32, #tpu.memory_space<vmem>>, vector<1x1x256xf32>
    %31 = vector.shape_cast %30 : vector<1x1x256xf32> to vector<1x256xf32>
    %cst_5 = arith.constant dense<0.000000e+00> : vector<1x256xf32>
    %32 = tpu.matmul %31, %29, %cst_5 {dimension_numbers = #tpu.dot_dimension_numbers<[1], [0], [0], [1], [0, 0, 1, 1], [], []>} : vector<1x256xf32>, vector<256x256xf32>, vector<1x256xf32> -> vector<1x256xf32>
    %c0_6 = arith.constant 0 : index
    %c0_7 = arith.constant 0 : index
    %c0_8 = arith.constant 0 : index
    %33 = vector.load %arg4[%c0_6, %c0_7, %c0_8] : memref<1x1x256xf32, #tpu.memory_space<vmem>>, vector<1x1x256xf32>
    %34 = vector.shape_cast %33 : vector<1x1x256xf32> to vector<1x256xf32>
    %35 = vector.shape_cast %32 : vector<1x256xf32> to vector<1x1x256xf32>
    tpu.vector_store %arg4[%c0_6, %c0_7, %c0_8], %35 {strides = array<i32>} : memref<1x1x256xf32, #tpu.memory_space<vmem>>, vector<1x1x256xf32>,
    return
  }
  func.func @transform_0(%arg0: i32, %arg1: memref<4xi32, #tpu.memory_space<smem>>, %arg2: memref<4xi32, #tpu.memory_space<smem>>) -> (i32, i32, i32) {
    %c0_i32 = arith.constant 0 : i32
    %c0_i32_0 = arith.constant 0 : i32
    %c0_i32_1 = arith.constant 0 : i32
    return %arg0, %c0_i32, %c0_i32_0 : i32, i32, i32
  }
  func.func @transform_1(%arg0: i32, %arg1: memref<4xi32, #tpu.memory_space<smem>>, %arg2: memref<4xi32, #tpu.memory_space<smem>>) -> (i32, i32, i32) {
    %c0_i32 = arith.constant 0 : i32
    %c0_i32_0 = arith.constant 0 : i32
    %c0_i32_1 = arith.constant 0 : i32
    return %arg0, %c0_i32, %c0_i32_0 : i32, i32, i32
  }
}

</mosaic_0001>

<bundles_post_ra>
// kernel: tpu_custom_call.1
= control target key start
LH: loop header
LB: loop body
LE: loop exit
PB: predicated region body
PF: predicated region fallthrough
CT: control target
= control target key end

     0   :  { %s2243_s0 = inlined_call_operand.hbm [shape: s32[4], index: 0, kind: input, shape index: {}]   ;;  %s2244_s2 = inlined_call_operand.hbm [shape: f32[4,1,256], index: 2, kind: input, shape index: {}]   ;;  %s2245_s3 = inlined_call_operand.hbm [shape: f32[4,1,256], index: 3, kind: output, shape index: {}]   ;;  %s2246_s1 = inlined_call_operand.vmem [shape: s32[4], index: 1, kind: input, shape index: {}]  }
   0x1   :  { %s1410_s14 = scalar_lea.hbm %s2243_s0, 16 }
   0x2   :  { %p1411_p0 = scmp.ne.s32.totalorder %s2243_s0, %s1410_s14  ;;  %p1414_p1 = scmp.lt.u32.totalorder %s1410_s14, %s2243_s0 }
   0x4   :  { %p1416_p2 = pnand %p1414_p1, %p1411_p0 }
   0x6   :  { %1419 = shalt.err (!%p1416_p2)  }
   0x7   :  { %s1532_s19 = smov [#allocation3]   ;;  %s10_s24 = sshll.u32 %s2246_s1, 4  ;;  %s11_s24 = int_to_ptr.vmem [resolvable:$true] %s10_s24 }
   0x8   :  { %9 = dma.hbm_to_smem %s2243_s0, 16, %s1532_s19, [#allocation2] }
   0x9   :  { %s1420_s25 = scalar_lea.vmem %s11_s24, 16  ;;  %p1425_p4 = scmp.lt.s32.totalorder %s11_s24, %s11_s24 }
   0xa   :  { %p1421_p3 = scmp.ne.s32.totalorder %s11_s24, %s1420_s25  ;;  %p1426_p5 = scmp.lt.s32.totalorder %s1420_s25, %s1420_s25 }
   0xc   :  { %p1427_p6 = por %p1426_p5, %p1425_p4 }
   0xe   :  { %p1428_p7 = pnand %p1427_p6, %p1421_p3 }
  0x10   :  { %1431 = shalt.err (!%p1428_p7)  }
  0x11   :  { %s1533_s26 = smov [#allocation4]  }
  0x12   :  { %13 = dma.vmem_to_smem %s11_s24, 16, %s1533_s26, [#allocation2] }
  0x13   :  { %1506 = dma.done.wait [#allocation2], 32 }
  0x14   :  { %1507 = vsyncadd [#allocation2], 4294967264 }
  0x15   :  { %15 = sfence }
  0x16   :  { %16 = vsyncpa [#allocation6], 0 }
  0x17   :  { %18 = vsyncpa [#allocation6 + $0x1], 0 }
  0x18   :  { %19 = vsyncpa [#allocation7], 0 }
  0x19   :  { %21 = vsyncpa [#allocation7 + $0x1], 0  ;;  %s1572_s0 = smov 0   ;;  %s1574_s1 = smov 0  }
  0x1a   :  { %s1576_s27 = smov 0   ;;  %s1578_s28 = smov 0  }
  0x1b LB: > { %s1593_s29 = sadd.s32 4294967295, %s1530_s28   ;;  %s1276_s30 = sadd.s32 4294967294, %s1530_s28   ;;  %s1530_s28 = sphi %s1578_s28, %s2316_s28   ;;  %s1526_s27 = sphi %s1576_s27, %s2315_s27   ;;  %s1522_s1 = sphi %s1574_s1, %s2314_s1   ;;  %s1518_s0 = sphi %s1572_s0, %s2313_s0  }
  0x1c   : > { %s1597_s4 = sadd.s32 1, %s1530_s28   ;;  %s34_s5 = sadd.s32 1, %s1526_s27 }
  0x1d   : > { %s31_s6 = ssub.s32 %s1530_s28, %s1597_s4  ;;  %p41_p8 = scmp.ne.s32.totalorder %s1526_s27, %s1522_s1 }
  0x1e   : > { %p32_p9 = scmp.eq.s32.totalorder %s31_s6, 0  ;;  %p42_p10 = scmp.eq.s32.totalorder %s1530_s28, 0 }
  0x1f   : > { %p47_p11 = scmp.ne.s32.totalorder %s1522_s1, %s1518_s0  ;;  %p48_p12 = scmp.eq.s32.totalorder %s1593_s29, 0 }
  0x20   : > { %s1609_s7 = scalar_select %p32_p9, %s1526_s27, %s34_s5  }
  0x21   : > { %p1611_p13 = por %p42_p10, %p41_p8  ;;  %p1615_p0 = por %p48_p12, %p47_p11 }
  0x22   : > { %p71_p1 = scmp.eq.s32.totalorder %s1593_s29, 3  ;;  %p77_p2 = scmp.eq.s32.totalorder %s1276_s30, 3 }
  0x23   : > { %p1371_p3 = scmp.lt.s32.totalorder %s1530_s28, 4  ;;  %s97_s12 = sand.u32 1, %s1526_s27  }
  0x24   : > { %p1621_p4 = por %p71_p1, %p41_p8  ;;  %p1625_p5 = por %p77_p2, %p47_p11 }
  0x25   : > { %s1293_s13 = sshll.u32 %s1530_s28, 5  ;;  %s1279_s14 = sshll.u32 %s97_s12, 1 }
  0x26   : > { %s2251_s10 = scalar_select %p1621_p4, 1, 0 }
  0x27   : > { %s2252_s11 = scalar_select %p1625_p5, 1, 0 }
  0x28   : > { %s1634_s17 = scalar_lea.hbm %s2244_s2, %s1293_s13  ;;  %s101_s18 = scalar_lea.vmem [#allocation5], %s1279_s14 }
  0x29   : > { %s109_s19 = sshll.u32 %s101_s18, 4  ;;  %p1638_p6 = pnand %p1371_p3, %p1611_p13  ;;  %s1642_s19 = int_to_ptr.vmem [resolvable:$true] %s109_s19 }
  0x2a   : > { %s98_s21 = scalar_lea.sflag [#allocation6], %s97_s12  ;;  %s1432_s22 = scalar_lea.hbm %s1634_s17, 32 }
  0x2b   : > { %p1433_p9 = scmp.ne.s32.totalorder %s1634_s17, %s1432_s22  ;;  %p1434_p10 = pneg %p1638_p6 }
  0x2c   : > { %s1437_s25 = scalar_lea.hbm %s2244_s2, 128  ;;  %p1438_p13 = scmp.lt.u32.totalorder %s1634_s17, %s2244_s2 }
  0x2d   : > { %p1435_p11 = pnand %p1434_p10, %p1433_p9  ;;  %p1439_p1 = scmp.lt.u32.totalorder %s1437_s25, %s1432_s22 }
  0x2e   : > { %p1441_p3 = scmp.lt.u32.totalorder %s1432_s22, %s1634_s17 }
  0x2f   : > { %p1436_p12 = pneg %p1435_p11  ;;  %p1440_p2 = por %p1439_p1, %p1438_p13 }
  0x31   : > { %p1442_p7 = por %p1441_p3, %p1440_p2 }
  0x33   : > { %p1443_p8 = pnand %p1442_p7, %p1436_p12 }
  0x35   : > { %1446 = shalt.err (!%p1443_p8)
}
  0x36   : > { %s1447_s5 = scalar_lea.vmem %s1642_s19, 32  ;;  %s1534_s6 = smov [#allocation5]  }
  0x37   : > { %p1448_p9 = scmp.ne.s32.totalorder %s1642_s19, %s1447_s5  ;;  %s1452_s8 = sshll.u32 %s1534_s6, 4  ;;  %s1453_s8 = int_to_ptr.vmem [resolvable:$false] %s1452_s8 }
  0x38   : > { %s1454_s12 = scalar_lea.vmem %s1453_s8, 64  ;;  %p1455_p4 = scmp.lt.s32.totalorder %s1642_s19, %s1453_s8 }
  0x39   : > { %p1450_p11 = pnand %p1448_p9, %p1434_p10  ;;  %p1456_p13 = scmp.lt.s32.totalorder %s1454_s12, %s1447_s5 }
  0x3b   : > { %p1451_p5 = pneg %p1450_p11  ;;  %p1457_p1 = por %p1456_p13, %p1455_p4 }
  0x3d   : > { %p1458_p2 = pnand %p1457_p1, %p1451_p5 }
  0x3f   : > { %1461 = shalt.err (!%p1458_p2)
}
  0x40   : > { %1366 = dma.hbm_to_vmem [thread:$0]  (!%p1638_p6), %s1634_s17, 32, %s1642_s19, %s98_s21  }
  0x41   : > { %p2254_p7 = scmp.lt.s32.totalorder %s1530_s28, 5  ;;  %p2255_p8 = scmp.ge.s32.totalorder %s1530_s28, 1 }
  0x43   : > { %p115_p10 = pnand %p2255_p8, %p2254_p7 }
  0x44   : > { %s1676_s13 = sand.u32 (!%p115_p10), 1, %s1522_s1  }
  0x45   : > { %118 = sbr.rel (%p115_p10) target bundleno = 644 (0x284), region = 24  ;;  %s1283_s14 = sshll.u32 (!%p115_p10), %s1676_s13, 1 }
  0x46   : > { %s121_s15 = scalar_lea.sflag (!%p115_p10), [#allocation6], %s1676_s13  ;;  %s1682_s16 = scalar_lea.vmem (!%p115_p10), [#allocation5], %s1283_s14 }
  0x4c   : > { %1509 = dma.done.wait (%p1615_p0), %s121_s15, 32  }
  0x4d   : > { %1511 = vsyncadd (%p1615_p0), %s121_s15, 4294967264  ;;  %v2248_v0 = vlaneseq  ;;  %s1689_s17 = sld [smem:[#allocation3 + %s1593_s29]]  ;;  %s1294_s21 = sshll.u32 %s1593_s29, 5 }
  0x4e   : > { %s1822_s18 = sld [smem:[#allocation4 + %s1593_s29]]  ;;  %s142_s22 = scalar_lea.vmem [#allocation8], %s1283_s14 }
  0x4f   : > { %v1692_v1 = vand.u32 127, %v2248_v0  ;;  %s1206_s23 = sshll.u32 %s142_s22, 4  ;;  %s2200_s26 = scalar_lea.hbm %s2245_s3, %s1294_s21  ;;  %s2202_s23 = int_to_ptr.vmem [resolvable:$true] %s1206_s23 }
  0x50   : > { %s1192_s30 = scalar_lea.sflag [#allocation7], %s1676_s13  ;;  %s1462_s29 = scalar_lea.vmem %s2202_s23, 32 }
  0x51   : > { %v1695_v2 = vadd.s32 128, %v1692_v1  ;;  %v158_v3 = vshll.u32 %v1692_v1, 1  ;;  %v155_v7 = vshrl.u32 %v1692_v1, 31  ;;  %p1463_p5 = scmp.ne.s32.totalorder %s2202_s23, %s1462_s29  ;;  %p2311_p6 = scmp.ne.s32.totalorder %s2251_s10, 0 }
  0x52   : > { %s1536_s5 = smov [#allocation8]  }
  0x53   : > { %v454_v4 = vshll.u32 %v1695_v2, 1  ;;  %v148_v5 = vstv %s1689_s17  ;;  %v451_v8 = vshrl.u32 %v1695_v2, 31  ;;  %v162_v9 = vadd.s32 1, %v158_v3  ;;  %s1287_s9 = sadd.s32 4294967295, %s1689_s17  ;;  %p741_p4 = scmp.gt.s32.totalorder %s1689_s17, 256 }
  0x54   : > { %v153_v6 = vsub.s32 0, %v148_v5  ;;  %p751_p0 = scmp.gt.s32.totalorder %s1287_s9, 1  ;;  %p1464_p12 = pnand %p1463_p5, %p2311_p6 }
  0x55   : > { %v458_v10 = vadd.s32 1, %v454_v4  ;;  %s1834_s20 = scalar_select %p741_p4, 1, 0 }
  0x56   : > { %v1702_v11 = vmin.u32 %v153_v6, %v148_v5  ;;  %s2318_s9 = smov (!%p751_p0, %s1287_s9), 1  ;;  %p1465_p3 = pneg %p1464_p12 }
  0x57   : > { %s753_s19 = scvt.s32.f32 %s2318_s9  ;;  %s1466_s6 = sshll.u32 %s1536_s5, 4  ;;  %s1467_s6 = int_to_ptr.vmem [resolvable:$false] %s1466_s6 }
  0x58   : > { %vm159_vm0 = vcmp.ge.u32.totalorder %v155_v7, %v1702_v11  ;;  %v160_v12 = vsub.s32 %v155_v7, %v1702_v11  ;;  %vm455_vm1 = vcmp.ge.u32.totalorder %v451_v8, %v1702_v11  ;;  %v456_v13 = vsub.s32 %v451_v8, %v1702_v11  ;;  %s1468_s8 = scalar_lea.vmem %s1467_s6, 64  ;;  %p1469_p9 = scmp.lt.s32.totalorder %s2202_s23, %s1467_s6 }
  0x59   : > { %v163_v14 = vsel %vm159_vm0, %v162_v9, %v158_v3  ;;  %v459_v15 = vsel %vm455_vm1, %v458_v10, %v454_v4  ;;  %p1470_p11 = scmp.lt.s32.totalorder %s1468_s8, %s1462_s29 }
  0x5a   : > { %v161_v16 = vsel %vm159_vm0, %v160_v12, %v155_v7  ;;  %v164_v17 = vshrl.u32 %v163_v14, 31  ;;  %v167_v18 = vshll.u32 %v163_v14, 1  ;;  %v457_v19 = vsel %vm455_vm1, %v456_v13, %v451_v8 }
  0x5b   : > { %v165_v20 = vshll.u32 %v161_v16, 1  ;;  %v460_v21 = vshrl.u32 %v459_v15, 31  ;;  %v461_v22 = vshll.u32 %v457_v19, 1  ;;  %v463_v23 = vshll.u32 %v459_v15, 1  ;;  %p1471_p13 = por %p1470_p11, %p1469_p9 }
  0x5c   : > { %v171_v24 = vadd.s32 1, %v167_v18 }
  0x5d   : > { %v166_v25 = vor.u32 %v165_v20, %v164_v17  ;;  %v462_v26 = vor.u32 %v461_v22, %v460_v21  ;;  %v467_v27 = vadd.s32 1, %v463_v23  ;;  %p1472_p1 = pnand %p1471_p13, %p1465_p3 }
  0x5f   : > { %vm168_vm2 = vcmp.ge.u32.totalorder %v166_v25, %v1702_v11  ;;  %v169_v28 = vsub.s32 %v166_v25, %v1702_v11  ;;  %vm464_vm3 = vcmp.ge.u32.totalorder %v462_v26, %v1702_v11  ;;  %v465_v29 = vsub.s32 %v462_v26, %v1702_v11 }
  0x60   : > { %v172_v30 = vsel %vm168_vm2, %v171_v24, %v167_v18  ;;  %v468_v31 = vsel %vm464_vm3, %v467_v27, %v463_v23 }
  0x61   : > { %v170_v32 = vsel %vm168_vm2, %v169_v28, %v166_v25  ;;  %v173_v33 = vshrl.u32 %v172_v30, 31  ;;  %v176_v34 = vshll.u32 %v172_v30, 1  ;;  %v466_v35 = vsel %vm464_vm3, %v465_v29, %v462_v26 }
  0x62   : > { %v174_v36 = vshll.u32 %v170_v32, 1  ;;  %v469_v37 = vshrl.u32 %v468_v31, 31  ;;  %v470_v38 = vshll.u32 %v466_v35, 1  ;;  %v472_v39 = vshll.u32 %v468_v31, 1 }
  0x63   : > { %v180_v40 = vadd.s32 1, %v176_v34 }
  0x64   : > { %v175_v41 = vor.u32 %v174_v36, %v173_v33  ;;  %v471_v42 = vor.u32 %v470_v38, %v469_v37  ;;  %v476_v43 = vadd.s32 1, %v472_v39 }
  0x66   : > { %vm177_vm4 = vcmp.ge.u32.totalorder %v175_v41, %v1702_v11  ;;  %v178_v44 = vsub.s32 %v175_v41, %v1702_v11  ;;  %vm473_vm5 = vcmp.ge.u32.totalorder %v471_v42, %v1702_v11  ;;  %v474_v45 = vsub.s32 %v471_v42, %v1702_v11 }
  0x67   : > { %v181_v46 = vsel %vm177_vm4, %v180_v40, %v176_v34  ;;  %v477_v47 = vsel %vm473_vm5, %v476_v43, %v472_v39 }
  0x68   : > { %v179_v48 = vsel %vm177_vm4, %v178_v44, %v175_v41  ;;  %v182_v49 = vshrl.u32 %v181_v46, 31  ;;  %v185_v50 = vshll.u32 %v181_v46, 1  ;;  %v475_v51 = vsel %vm473_vm5, %v474_v45, %v471_v42 }
  0x69   : > { %v183_v52 = vshll.u32 %v179_v48, 1  ;;  %v478_v53 = vshrl.u32 %v477_v47, 31  ;;  %v479_v54 = vshll.u32 %v475_v51, 1  ;;  %v481_v55 = vshll.u32 %v477_v47, 1 }
  0x6a   : > { %v189_v56 = vadd.s32 1, %v185_v50 }
  0x6b   : > { %v184_v57 = vor.u32 %v183_v52, %v182_v49  ;;  %v480_v58 = vor.u32 %v479_v54, %v478_v53  ;;  %v485_v59 = vadd.s32 1, %v481_v55 }
  0x6d   : > { %vm186_vm6 = vcmp.ge.u32.totalorder %v184_v57, %v1702_v11  ;;  %v187_v60 = vsub.s32 %v184_v57, %v1702_v11  ;;  %vm482_vm7 = vcmp.ge.u32.totalorder %v480_v58, %v1702_v11  ;;  %v483_v61 = vsub.s32 %v480_v58, %v1702_v11 }
  0x6e   : > { %v190_v62 = vsel %vm186_vm6, %v189_v56, %v185_v50  ;;  %v486_v63 = vsel %vm482_vm7, %v485_v59, %v481_v55 }
  0x6f   : > { %v188_v3 = vsel %vm186_vm6, %v187_v60, %v184_v57  ;;  %v191_v4 = vshrl.u32 %v190_v62, 31  ;;  %v194_v5 = vshll.u32 %v190_v62, 1  ;;  %v484_v6 = vsel %vm482_vm7, %v483_v61, %v480_v58 }
  0x70   : > { %v192_v7 = vshll.u32 %v188_v3, 1  ;;  %v487_v8 = vshrl.u32 %v486_v63, 31  ;;  %v488_v9 = vshll.u32 %v484_v6, 1  ;;  %v490_v10 = vshll.u32 %v486_v63, 1 }
  0x71   : > { %v198_v12 = vadd.s32 1, %v194_v5 }
  0x72   : > { %v193_v13 = vor.u32 %v192_v7, %v191_v4  ;;  %v489_v14 = vor.u32 %v488_v9, %v487_v8  ;;  %v494_v15 = vadd.s32 1, %v490_v10 }
  0x74   : > { %vm195_vm8 = vcmp.ge.u32.totalorder %v193_v13, %v1702_v11  ;;  %v196_v16 = vsub.s32 %v193_v13, %v1702_v11  ;;  %vm491_vm9 = vcmp.ge.u32.totalorder %v489_v14, %v1702_v11  ;;  %v492_v17 = vsub.s32 %v489_v14, %v1702_v11 }
  0x75   : > { %v199_v18 = vsel %vm195_vm8, %v198_v12, %v194_v5  ;;  %v495_v19 = vsel %vm491_vm9, %v494_v15, %v490_v10 }
  0x76   : > { %v197_v20 = vsel %vm195_vm8, %v196_v16, %v193_v13  ;;  %v200_v21 = vshrl.u32 %v199_v18, 31  ;;  %v203_v22 = vshll.u32 %v199_v18, 1  ;;  %v493_v23 = vsel %vm491_vm9, %v492_v17, %v489_v14 }
  0x77   : > { %v201_v24 = vshll.u32 %v197_v20, 1  ;;  %v496_v25 = vshrl.u32 %v495_v19, 31  ;;  %v497_v26 = vshll.u32 %v493_v23, 1  ;;  %v499_v27 = vshll.u32 %v495_v19, 1 }
  0x78   : > { %v207_v28 = vadd.s32 1, %v203_v22 }
  0x79   : > { %v202_v29 = vor.u32 %v201_v24, %v200_v21  ;;  %v498_v30 = vor.u32 %v497_v26, %v496_v25  ;;  %v503_v31 = vadd.s32 1, %v499_v27 }
  0x7b   : > { %vm204_vm10 = vcmp.ge.u32.totalorder %v202_v29, %v1702_v11  ;;  %v205_v32 = vsub.s32 %v202_v29, %v1702_v11  ;;  %vm500_vm11 = vcmp.ge.u32.totalorder %v498_v30, %v1702_v11  ;;  %v501_v33 = vsub.s32 %v498_v30, %v1702_v11 }
  0x7c   : > { %v208_v34 = vsel %vm204_vm10, %v207_v28, %v203_v22  ;;  %v504_v35 = vsel %vm500_vm11, %v503_v31, %v499_v27 }
  0x7d   : > { %v206_v36 = vsel %vm204_vm10, %v205_v32, %v202_v29  ;;  %v209_v37 = vshrl.u32 %v208_v34, 31  ;;  %v212_v38 = vshll.u32 %v208_v34, 1  ;;  %v502_v39 = vsel %vm500_vm11, %v501_v33, %v498_v30 }
  0x7e   : > { %v210_v40 = vshll.u32 %v206_v36, 1  ;;  %v505_v41 = vshrl.u32 %v504_v35, 31  ;;  %v506_v42 = vshll.u32 %v502_v39, 1  ;;  %v508_v43 = vshll.u32 %v504_v35, 1 }
  0x7f   : > { %v216_v44 = vadd.s32 1, %v212_v38 }
  0x80   : > { %v211_v45 = vor.u32 %v210_v40, %v209_v37  ;;  %v507_v46 = vor.u32 %v506_v42, %v505_v41  ;;  %v512_v47 = vadd.s32 1, %v508_v43 }
  0x82   : > { %vm213_vm12 = vcmp.ge.u32.totalorder %v211_v45, %v1702_v11  ;;  %v214_v48 = vsub.s32 %v211_v45, %v1702_v11  ;;  %vm509_vm13 = vcmp.ge.u32.totalorder %v507_v46, %v1702_v11  ;;  %v510_v49 = vsub.s32 %v507_v46, %v1702_v11 }
  0x83   : > { %v217_v50 = vsel %vm213_vm12, %v216_v44, %v212_v38  ;;  %v513_v51 = vsel %vm509_vm13, %v512_v47, %v508_v43 }
  0x84   : > { %v215_v52 = vsel %vm213_vm12, %v214_v48, %v211_v45  ;;  %v218_v53 = vshrl.u32 %v217_v50, 31  ;;  %v221_v54 = vshll.u32 %v217_v50, 1  ;;  %v511_v55 = vsel %vm509_vm13, %v510_v49, %v507_v46 }
  0x85   : > { %v219_v56 = vshll.u32 %v215_v52, 1  ;;  %v514_v57 = vshrl.u32 %v513_v51, 31  ;;  %v515_v58 = vshll.u32 %v511_v55, 1  ;;  %v517_v59 = vshll.u32 %v513_v51, 1 }
  0x86   : > { %v225_v60 = vadd.s32 1, %v221_v54 }
  0x87   : > { %v220_v61 = vor.u32 %v219_v56, %v218_v53  ;;  %v516_v62 = vor.u32 %v515_v58, %v514_v57  ;;  %v521_v63 = vadd.s32 1, %v517_v59 }
  0x89   : > { %vm222_vm14 = vcmp.ge.u32.totalorder %v220_v61, %v1702_v11  ;;  %v223_v3 = vsub.s32 %v220_v61, %v1702_v11  ;;  %vm518_vm15 = vcmp.ge.u32.totalorder %v516_v62, %v1702_v11  ;;  %v519_v4 = vsub.s32 %v516_v62, %v1702_v11 }
  0x8a   : > { %v226_v5 = vsel %vm222_vm14, %v225_v60, %v221_v54  ;;  %v522_v6 = vsel %vm518_vm15, %v521_v63, %v517_v59 }
  0x8b   : > { %v224_v7 = vsel %vm222_vm14, %v223_v3, %v220_v61  ;;  %v227_v8 = vshrl.u32 %v226_v5, 31  ;;  %v230_v9 = vshll.u32 %v226_v5, 1  ;;  %v520_v10 = vsel %vm518_vm15, %v519_v4, %v516_v62 }
  0x8c   : > { %v228_v12 = vshll.u32 %v224_v7, 1  ;;  %v523_v13 = vshrl.u32 %v522_v6, 31  ;;  %v524_v14 = vshll.u32 %v520_v10, 1  ;;  %v526_v15 = vshll.u32 %v522_v6, 1 }
  0x8d   : > { %v234_v16 = vadd.s32 1, %v230_v9 }
  0x8e   : > { %v229_v17 = vor.u32 %v228_v12, %v227_v8  ;;  %v525_v18 = vor.u32 %v524_v14, %v523_v13  ;;  %v530_v19 = vadd.s32 1, %v526_v15 }
  0x90   : > { %vm231_vm0 = vcmp.ge.u32.totalorder %v229_v17, %v1702_v11  ;;  %v232_v20 = vsub.s32 %v229_v17, %v1702_v11  ;;  %vm527_vm1 = vcmp.ge.u32.totalorder %v525_v18, %v1702_v11  ;;  %v528_v21 = vsub.s32 %v525_v18, %v1702_v11 }
  0x91   : > { %v235_v22 = vsel %vm231_vm0, %v234_v16, %v230_v9  ;;  %v531_v23 = vsel %vm527_vm1, %v530_v19, %v526_v15 }
  0x92   : > { %v233_v24 = vsel %vm231_vm0, %v232_v20, %v229_v17  ;;  %v236_v25 = vshrl.u32 %v235_v22, 31  ;;  %v239_v26 = vshll.u32 %v235_v22, 1  ;;  %v529_v27 = vsel %vm527_vm1, %v528_v21, %v525_v18 }
  0x93   : > { %v237_v28 = vshll.u32 %v233_v24, 1  ;;  %v532_v29 = vshrl.u32 %v531_v23, 31  ;;  %v533_v30 = vshll.u32 %v529_v27, 1  ;;  %v535_v31 = vshll.u32 %v531_v23, 1 }
  0x94   : > { %v243_v32 = vadd.s32 1, %v239_v26 }
  0x95   : > { %v238_v33 = vor.u32 %v237_v28, %v236_v25  ;;  %v534_v34 = vor.u32 %v533_v30, %v532_v29  ;;  %v539_v35 = vadd.s32 1, %v535_v31 }
  0x97   : > { %vm240_vm2 = vcmp.ge.u32.totalorder %v238_v33, %v1702_v11  ;;  %v241_v36 = vsub.s32 %v238_v33, %v1702_v11  ;;  %vm536_vm3 = vcmp.ge.u32.totalorder %v534_v34, %v1702_v11  ;;  %v537_v37 = vsub.s32 %v534_v34, %v1702_v11 }
  0x98   : > { %v244_v38 = vsel %vm240_vm2, %v243_v32, %v239_v26  ;;  %v540_v39 = vsel %vm536_vm3, %v539_v35, %v535_v31 }
  0x99   : > { %v242_v40 = vsel %vm240_vm2, %v241_v36, %v238_v33  ;;  %v245_v41 = vshrl.u32 %v244_v38, 31  ;;  %v248_v42 = vshll.u32 %v244_v38, 1  ;;  %v538_v43 = vsel %vm536_vm3, %v537_v37, %v534_v34 }
  0x9a   : > { %v246_v44 = vshll.u32 %v242_v40, 1  ;;  %v541_v45 = vshrl.u32 %v540_v39, 31  ;;  %v542_v46 = vshll.u32 %v538_v43, 1  ;;  %v544_v47 = vshll.u32 %v540_v39, 1 }
  0x9b   : > { %v252_v48 = vadd.s32 1, %v248_v42 }
  0x9c   : > { %v247_v49 = vor.u32 %v246_v44, %v245_v41  ;;  %v543_v50 = vor.u32 %v542_v46, %v541_v45  ;;  %v548_v51 = vadd.s32 1, %v544_v47 }
  0x9e   : > { %vm249_vm4 = vcmp.ge.u32.totalorder %v247_v49, %v1702_v11  ;;  %v250_v52 = vsub.s32 %v247_v49, %v1702_v11  ;;  %vm545_vm5 = vcmp.ge.u32.totalorder %v543_v50, %v1702_v11  ;;  %v546_v53 = vsub.s32 %v543_v50, %v1702_v11 }
  0x9f   : > { %v253_v54 = vsel %vm249_vm4, %v252_v48, %v248_v42  ;;  %v549_v55 = vsel %vm545_vm5, %v548_v51, %v544_v47 }
  0xa0   : > { %v251_v56 = vsel %vm249_vm4, %v250_v52, %v247_v49  ;;  %v254_v57 = vshrl.u32 %v253_v54, 31  ;;  %v257_v58 = vshll.u32 %v253_v54, 1  ;;  %v547_v59 = vsel %vm545_vm5, %v546_v53, %v543_v50 }
  0xa1   : > { %v255_v60 = vshll.u32 %v251_v56, 1  ;;  %v550_v61 = vshrl.u32 %v549_v55, 31  ;;  %v551_v62 = vshll.u32 %v547_v59, 1  ;;  %v553_v63 = vshll.u32 %v549_v55, 1 }
  0xa2   : > { %v261_v3 = vadd.s32 1, %v257_v58 }
  0xa3   : > { %v256_v4 = vor.u32 %v255_v60, %v254_v57  ;;  %v552_v5 = vor.u32 %v551_v62, %v550_v61  ;;  %v557_v6 = vadd.s32 1, %v553_v63 }
  0xa5   : > { %vm258_vm6 = vcmp.ge.u32.totalorder %v256_v4, %v1702_v11  ;;  %v259_v7 = vsub.s32 %v256_v4, %v1702_v11  ;;  %vm554_vm7 = vcmp.ge.u32.totalorder %v552_v5, %v1702_v11  ;;  %v555_v8 = vsub.s32 %v552_v5, %v1702_v11 }
  0xa6   : > { %v262_v9 = vsel %vm258_vm6, %v261_v3, %v257_v58  ;;  %v558_v10 = vsel %vm554_vm7, %v557_v6, %v553_v63 }
  0xa7   : > { %v260_v12 = vsel %vm258_vm6, %v259_v7, %v256_v4  ;;  %v263_v13 = vshrl.u32 %v262_v9, 31  ;;  %v266_v14 = vshll.u32 %v262_v9, 1  ;;  %v556_v15 = vsel %vm554_vm7, %v555_v8, %v552_v5 }
  0xa8   : > { %v264_v16 = vshll.u32 %v260_v12, 1  ;;  %v559_v17 = vshrl.u32 %v558_v10, 31  ;;  %v560_v18 = vshll.u32 %v556_v15, 1  ;;  %v562_v19 = vshll.u32 %v558_v10, 1 }
  0xa9   : > { %v270_v20 = vadd.s32 1, %v266_v14 }
  0xaa   : > { %v265_v21 = vor.u32 %v264_v16, %v263_v13  ;;  %v561_v22 = vor.u32 %v560_v18, %v559_v17  ;;  %v566_v23 = vadd.s32 1, %v562_v19 }
  0xac   : > { %vm267_vm8 = vcmp.ge.u32.totalorder %v265_v21, %v1702_v11  ;;  %v268_v24 = vsub.s32 %v265_v21, %v1702_v11  ;;  %vm563_vm9 = vcmp.ge.u32.totalorder %v561_v22, %v1702_v11  ;;  %v564_v25 = vsub.s32 %v561_v22, %v1702_v11 }
  0xad   : > { %v271_v26 = vsel %vm267_vm8, %v270_v20, %v266_v14  ;;  %v567_v27 = vsel %vm563_vm9, %v566_v23, %v562_v19 }
  0xae   : > { %v269_v28 = vsel %vm267_vm8, %v268_v24, %v265_v21  ;;  %v272_v29 = vshrl.u32 %v271_v26, 31  ;;  %v275_v30 = vshll.u32 %v271_v26, 1  ;;  %v565_v31 = vsel %vm563_vm9, %v564_v25, %v561_v22 }
  0xaf   : > { %v273_v32 = vshll.u32 %v269_v28, 1  ;;  %v568_v33 = vshrl.u32 %v567_v27, 31  ;;  %v569_v34 = vshll.u32 %v565_v31, 1  ;;  %v571_v35 = vshll.u32 %v567_v27, 1 }
  0xb0   : > { %v279_v36 = vadd.s32 1, %v275_v30 }
  0xb1   : > { %v274_v37 = vor.u32 %v273_v32, %v272_v29  ;;  %v570_v38 = vor.u32 %v569_v34, %v568_v33  ;;  %v575_v39 = vadd.s32 1, %v571_v35 }
  0xb3   : > { %vm276_vm10 = vcmp.ge.u32.totalorder %v274_v37, %v1702_v11  ;;  %v277_v40 = vsub.s32 %v274_v37, %v1702_v11  ;;  %vm572_vm11 = vcmp.ge.u32.totalorder %v570_v38, %v1702_v11  ;;  %v573_v41 = vsub.s32 %v570_v38, %v1702_v11 }
  0xb4   : > { %v280_v42 = vsel %vm276_vm10, %v279_v36, %v275_v30  ;;  %v576_v43 = vsel %vm572_vm11, %v575_v39, %v571_v35 }
  0xb5   : > { %v278_v44 = vsel %vm276_vm10, %v277_v40, %v274_v37  ;;  %v281_v45 = vshrl.u32 %v280_v42, 31  ;;  %v284_v46 = vshll.u32 %v280_v42, 1  ;;  %v574_v47 = vsel %vm572_vm11, %v573_v41, %v570_v38 }
  0xb6   : > { %v282_v48 = vshll.u32 %v278_v44, 1  ;;  %v577_v49 = vshrl.u32 %v576_v43, 31  ;;  %v578_v50 = vshll.u32 %v574_v47, 1  ;;  %v580_v51 = vshll.u32 %v576_v43, 1 }
  0xb7   : > { %v288_v52 = vadd.s32 1, %v284_v46 }
  0xb8   : > { %v283_v53 = vor.u32 %v282_v48, %v281_v45  ;;  %v579_v54 = vor.u32 %v578_v50, %v577_v49  ;;  %v584_v55 = vadd.s32 1, %v580_v51 }
  0xba   : > { %vm285_vm12 = vcmp.ge.u32.totalorder %v283_v53, %v1702_v11  ;;  %v286_v56 = vsub.s32 %v283_v53, %v1702_v11  ;;  %vm581_vm13 = vcmp.ge.u32.totalorder %v579_v54, %v1702_v11  ;;  %v582_v57 = vsub.s32 %v579_v54, %v1702_v11 }
  0xbb   : > { %v289_v58 = vsel %vm285_vm12, %v288_v52, %v284_v46  ;;  %v585_v59 = vsel %vm581_vm13, %v584_v55, %v580_v51 }
  0xbc   : > { %v287_v60 = vsel %vm285_vm12, %v286_v56, %v283_v53  ;;  %v290_v61 = vshrl.u32 %v289_v58, 31  ;;  %v293_v62 = vshll.u32 %v289_v58, 1  ;;  %v583_v63 = vsel %vm581_vm13, %v582_v57, %v579_v54 }
  0xbd   : > { %v291_v3 = vshll.u32 %v287_v60, 1  ;;  %v586_v4 = vshrl.u32 %v585_v59, 31  ;;  %v587_v5 = vshll.u32 %v583_v63, 1  ;;  %v589_v6 = vshll.u32 %v585_v59, 1 }
  0xbe   : > { %v297_v7 = vadd.s32 1, %v293_v62 }
  0xbf   : > { %v292_v8 = vor.u32 %v291_v3, %v290_v61  ;;  %v588_v9 = vor.u32 %v587_v5, %v586_v4  ;;  %v593_v10 = vadd.s32 1, %v589_v6 }
  0xc1   : > { %vm294_vm14 = vcmp.ge.u32.totalorder %v292_v8, %v1702_v11  ;;  %v295_v12 = vsub.s32 %v292_v8, %v1702_v11  ;;  %vm590_vm15 = vcmp.ge.u32.totalorder %v588_v9, %v1702_v11  ;;  %v591_v13 = vsub.s32 %v588_v9, %v1702_v11 }
  0xc2   : > { %v298_v14 = vsel %vm294_vm14, %v297_v7, %v293_v62  ;;  %v594_v15 = vsel %vm590_vm15, %v593_v10, %v589_v6 }
  0xc3   : > { %v296_v16 = vsel %vm294_vm14, %v295_v12, %v292_v8  ;;  %v299_v17 = vshrl.u32 %v298_v14, 31  ;;  %v302_v18 = vshll.u32 %v298_v14, 1  ;;  %v592_v19 = vsel %vm590_vm15, %v591_v13, %v588_v9 }
  0xc4   : > { %v300_v20 = vshll.u32 %v296_v16, 1  ;;  %v595_v21 = vshrl.u32 %v594_v15, 31  ;;  %v596_v22 = vshll.u32 %v592_v19, 1  ;;  %v598_v23 = vshll.u32 %v594_v15, 1 }
  0xc5   : > { %v306_v24 = vadd.s32 1, %v302_v18 }
  0xc6   : > { %v301_v25 = vor.u32 %v300_v20, %v299_v17  ;;  %v597_v26 = vor.u32 %v596_v22, %v595_v21  ;;  %v602_v27 = vadd.s32 1, %v598_v23 }
  0xc8   : > { %vm303_vm0 = vcmp.ge.u32.totalorder %v301_v25, %v1702_v11  ;;  %v304_v28 = vsub.s32 %v301_v25, %v1702_v11  ;;  %vm599_vm1 = vcmp.ge.u32.totalorder %v597_v26, %v1702_v11  ;;  %v600_v29 = vsub.s32 %v597_v26, %v1702_v11 }
  0xc9   : > { %v307_v30 = vsel %vm303_vm0, %v306_v24, %v302_v18  ;;  %v603_v31 = vsel %vm599_vm1, %v602_v27, %v598_v23 }
  0xca   : > { %v305_v32 = vsel %vm303_vm0, %v304_v28, %v301_v25  ;;  %v308_v33 = vshrl.u32 %v307_v30, 31  ;;  %v311_v34 = vshll.u32 %v307_v30, 1  ;;  %v601_v35 = vsel %vm599_vm1, %v600_v29, %v597_v26 }
  0xcb   : > { %v309_v36 = vshll.u32 %v305_v32, 1  ;;  %v604_v37 = vshrl.u32 %v603_v31, 31  ;;  %v605_v38 = vshll.u32 %v601_v35, 1  ;;  %v607_v39 = vshll.u32 %v603_v31, 1 }
  0xcc   : > { %v315_v40 = vadd.s32 1, %v311_v34 }
  0xcd   : > { %v310_v41 = vor.u32 %v309_v36, %v308_v33  ;;  %v606_v42 = vor.u32 %v605_v38, %v604_v37  ;;  %v611_v43 = vadd.s32 1, %v607_v39 }
  0xcf   : > { %vm312_vm2 = vcmp.ge.u32.totalorder %v310_v41, %v1702_v11  ;;  %v313_v44 = vsub.s32 %v310_v41, %v1702_v11  ;;  %vm608_vm3 = vcmp.ge.u32.totalorder %v606_v42, %v1702_v11  ;;  %v609_v45 = vsub.s32 %v606_v42, %v1702_v11 }
  0xd0   : > { %v316_v46 = vsel %vm312_vm2, %v315_v40, %v311_v34  ;;  %v612_v47 = vsel %vm608_vm3, %v611_v43, %v607_v39 }
  0xd1   : > { %v314_v48 = vsel %vm312_vm2, %v313_v44, %v310_v41  ;;  %v317_v49 = vshrl.u32 %v316_v46, 31  ;;  %v320_v50 = vshll.u32 %v316_v46, 1  ;;  %v610_v51 = vsel %vm608_vm3, %v609_v45, %v606_v42 }
  0xd2   : > { %v318_v52 = vshll.u32 %v314_v48, 1  ;;  %v613_v53 = vshrl.u32 %v612_v47, 31  ;;  %v614_v54 = vshll.u32 %v610_v51, 1  ;;  %v616_v55 = vshll.u32 %v612_v47, 1 }
  0xd3   : > { %v324_v56 = vadd.s32 1, %v320_v50 }
  0xd4   : > { %v319_v57 = vor.u32 %v318_v52, %v317_v49  ;;  %v615_v58 = vor.u32 %v614_v54, %v613_v53  ;;  %v620_v59 = vadd.s32 1, %v616_v55 }
  0xd6   : > { %vm321_vm4 = vcmp.ge.u32.totalorder %v319_v57, %v1702_v11  ;;  %v322_v60 = vsub.s32 %v319_v57, %v1702_v11  ;;  %vm617_vm5 = vcmp.ge.u32.totalorder %v615_v58, %v1702_v11  ;;  %v618_v61 = vsub.s32 %v615_v58, %v1702_v11 }
  0xd7   : > { %v325_v62 = vsel %vm321_vm4, %v324_v56, %v320_v50  ;;  %v621_v63 = vsel %vm617_vm5, %v620_v59, %v616_v55 }
  0xd8   : > { %v323_v3 = vsel %vm321_vm4, %v322_v60, %v319_v57  ;;  %v326_v4 = vshrl.u32 %v325_v62, 31  ;;  %v329_v5 = vshll.u32 %v325_v62, 1  ;;  %v619_v6 = vsel %vm617_vm5, %v618_v61, %v615_v58 }
  0xd9   : > { %v327_v7 = vshll.u32 %v323_v3, 1  ;;  %v622_v8 = vshrl.u32 %v621_v63, 31  ;;  %v623_v9 = vshll.u32 %v619_v6, 1  ;;  %v625_v10 = vshll.u32 %v621_v63, 1 }
  0xda   : > { %v333_v12 = vadd.s32 1, %v329_v5 }
  0xdb   : > { %v328_v13 = vor.u32 %v327_v7, %v326_v4  ;;  %v624_v14 = vor.u32 %v623_v9, %v622_v8  ;;  %v629_v15 = vadd.s32 1, %v625_v10 }
  0xdd   : > { %vm330_vm6 = vcmp.ge.u32.totalorder %v328_v13, %v1702_v11  ;;  %v331_v16 = vsub.s32 %v328_v13, %v1702_v11  ;;  %vm626_vm7 = vcmp.ge.u32.totalorder %v624_v14, %v1702_v11  ;;  %v627_v17 = vsub.s32 %v624_v14, %v1702_v11 }
  0xde   : > { %v334_v18 = vsel %vm330_vm6, %v333_v12, %v329_v5  ;;  %v630_v19 = vsel %vm626_vm7, %v629_v15, %v625_v10 }
  0xdf   : > { %v332_v20 = vsel %vm330_vm6, %v331_v16, %v328_v13  ;;  %v335_v21 = vshrl.u32 %v334_v18, 31  ;;  %v338_v22 = vshll.u32 %v334_v18, 1  ;;  %v628_v23 = vsel %vm626_vm7, %v627_v17, %v624_v14 }
  0xe0   : > { %v336_v24 = vshll.u32 %v332_v20, 1  ;;  %v631_v25 = vshrl.u32 %v630_v19, 31  ;;  %v632_v26 = vshll.u32 %v628_v23, 1  ;;  %v634_v27 = vshll.u32 %v630_v19, 1 }
  0xe1   : > { %v342_v28 = vadd.s32 1, %v338_v22 }
  0xe2   : > { %v337_v29 = vor.u32 %v336_v24, %v335_v21  ;;  %v633_v30 = vor.u32 %v632_v26, %v631_v25  ;;  %v638_v31 = vadd.s32 1, %v634_v27 }
  0xe4   : > { %vm339_vm8 = vcmp.ge.u32.totalorder %v337_v29, %v1702_v11  ;;  %v340_v32 = vsub.s32 %v337_v29, %v1702_v11  ;;  %vm635_vm9 = vcmp.ge.u32.totalorder %v633_v30, %v1702_v11  ;;  %v636_v33 = vsub.s32 %v633_v30, %v1702_v11 }
  0xe5   : > { %v343_v34 = vsel %vm339_vm8, %v342_v28, %v338_v22  ;;  %v639_v35 = vsel %vm635_vm9, %v638_v31, %v634_v27 }
  0xe6   : > { %v341_v36 = vsel %vm339_vm8, %v340_v32, %v337_v29  ;;  %v344_v37 = vshrl.u32 %v343_v34, 31  ;;  %v347_v38 = vshll.u32 %v343_v34, 1  ;;  %v637_v39 = vsel %vm635_vm9, %v636_v33, %v633_v30 }
  0xe7   : > { %v345_v40 = vshll.u32 %v341_v36, 1  ;;  %v640_v41 = vshrl.u32 %v639_v35, 31  ;;  %v641_v42 = vshll.u32 %v637_v39, 1  ;;  %v643_v43 = vshll.u32 %v639_v35, 1 }
  0xe8   : > { %v351_v44 = vadd.s32 1, %v347_v38 }
  0xe9   : > { %v346_v45 = vor.u32 %v345_v40, %v344_v37  ;;  %v642_v46 = vor.u32 %v641_v42, %v640_v41  ;;  %v647_v47 = vadd.s32 1, %v643_v43 }
  0xeb   : > { %vm348_vm10 = vcmp.ge.u32.totalorder %v346_v45, %v1702_v11  ;;  %v349_v48 = vsub.s32 %v346_v45, %v1702_v11  ;;  %vm644_vm11 = vcmp.ge.u32.totalorder %v642_v46, %v1702_v11  ;;  %v645_v49 = vsub.s32 %v642_v46, %v1702_v11 }
  0xec   : > { %v352_v50 = vsel %vm348_vm10, %v351_v44, %v347_v38  ;;  %v648_v51 = vsel %vm644_vm11, %v647_v47, %v643_v43 }
  0xed   : > { %v350_v52 = vsel %vm348_vm10, %v349_v48, %v346_v45  ;;  %v353_v53 = vshrl.u32 %v352_v50, 31  ;;  %v356_v54 = vshll.u32 %v352_v50, 1  ;;  %v646_v55 = vsel %vm644_vm11, %v645_v49, %v642_v46 }
  0xee   : > { %v354_v56 = vshll.u32 %v350_v52, 1  ;;  %v649_v57 = vshrl.u32 %v648_v51, 31  ;;  %v650_v58 = vshll.u32 %v646_v55, 1  ;;  %v652_v59 = vshll.u32 %v648_v51, 1 }
  0xef   : > { %v360_v60 = vadd.s32 1, %v356_v54  ;;  %v1805_v52 = vshrl.u32 %v2248_v0, 7 }
  0xf0   : > { %v355_v61 = vor.u32 %v354_v56, %v353_v53  ;;  %v651_v62 = vor.u32 %v650_v58, %v649_v57  ;;  %v656_v63 = vadd.s32 1, %v652_v59 }
  0xf1   : > { %v1093_v57 = vsub.s32 1, %v1805_v52 }
  0xf2   : > { %vm357_vm12 = vcmp.ge.u32.totalorder %v355_v61, %v1702_v11  ;;  %v358_v3 = vsub.s32 %v355_v61, %v1702_v11  ;;  %vm653_vm13 = vcmp.ge.u32.totalorder %v651_v62, %v1702_v11  ;;  %v654_v4 = vsub.s32 %v651_v62, %v1702_v11 }
  0xf3   : > { %v361_v5 = vsel %vm357_vm12, %v360_v60, %v356_v54  ;;  %v657_v6 = vsel %vm653_vm13, %v656_v63, %v652_v59 }
  0xf4   : > { %v359_v7 = vsel %vm357_vm12, %v358_v3, %v355_v61  ;;  %v362_v8 = vshrl.u32 %v361_v5, 31  ;;  %v365_v9 = vshll.u32 %v361_v5, 1  ;;  %v655_v10 = vsel %vm653_vm13, %v654_v4, %v651_v62  ;;  %v1814_v62 = vld [vmem:[%s1682_s16] sm:$0x3] }
  0xf5   : > { %v363_v12 = vshll.u32 %v359_v7, 1  ;;  %v658_v13 = vshrl.u32 %v657_v6, 31  ;;  %v659_v14 = vshll.u32 %v655_v10, 1  ;;  %v661_v15 = vshll.u32 %v657_v6, 1 }
  0xf6   : > { %v369_v16 = vadd.s32 1, %v365_v9  ;;  %v1094_v7 = vrot.slane %v1814_v62, %v1093_v57 }
  0xf7   : > { %v364_v17 = vor.u32 %v363_v12, %v362_v8  ;;  %v660_v18 = vor.u32 %v659_v14, %v658_v13  ;;  %v665_v19 = vadd.s32 1, %v661_v15 }
  0xf8   : > { %1161 = vmatprep.mubr.f32.mxu0 %v1094_v7 }
  0xf9   : > { %vm366_vm14 = vcmp.ge.u32.totalorder %v364_v17, %v1702_v11  ;;  %v367_v20 = vsub.s32 %v364_v17, %v1702_v11  ;;  %vm662_vm15 = vcmp.ge.u32.totalorder %v660_v18, %v1702_v11  ;;  %v663_v21 = vsub.s32 %v660_v18, %v1702_v11 }
  0xfa   : > { %v370_v22 = vsel %vm366_vm14, %v369_v16, %v365_v9  ;;  %v666_v23 = vsel %vm662_vm15, %v665_v19, %v661_v15 }
  0xfb   : > { %v368_v24 = vsel %vm366_vm14, %v367_v20, %v364_v17  ;;  %v371_v25 = vshrl.u32 %v370_v22, 31  ;;  %v374_v26 = vshll.u32 %v370_v22, 1  ;;  %v664_v27 = vsel %vm662_vm15, %v663_v21, %v660_v18 }
  0xfc   : > { %v372_v28 = vshll.u32 %v368_v24, 1  ;;  %v667_v29 = vshrl.u32 %v666_v23, 31  ;;  %v668_v30 = vshll.u32 %v664_v27, 1  ;;  %v670_v31 = vshll.u32 %v666_v23, 1 }
  0xfd   : > { %v378_v32 = vadd.s32 1, %v374_v26 }
  0xfe   : > { %v373_v33 = vor.u32 %v372_v28, %v371_v25  ;;  %v669_v34 = vor.u32 %v668_v30, %v667_v29  ;;  %v674_v35 = vadd.s32 1, %v670_v31 }
 0x100   : > { %vm375_vm0 = vcmp.ge.u32.totalorder %v373_v33, %v1702_v11  ;;  %v376_v36 = vsub.s32 %v373_v33, %v1702_v11  ;;  %vm671_vm1 = vcmp.ge.u32.totalorder %v669_v34, %v1702_v11  ;;  %v672_v37 = vsub.s32 %v669_v34, %v1702_v11 }
 0x101   : > { %v379_v38 = vsel %vm375_vm0, %v378_v32, %v374_v26  ;;  %v675_v39 = vsel %vm671_vm1, %v674_v35, %v670_v31  ;;  %v758_v32 = vstv %s753_s19 }
 0x102   : > { %v377_v40 = vsel %vm375_vm0, %v376_v36, %v373_v33  ;;  %v380_v41 = vshrl.u32 %v379_v38, 31  ;;  %v383_v42 = vshll.u32 %v379_v38, 1  ;;  %v673_v43 = vsel %vm671_vm1, %v672_v37, %v669_v34 }
 0x103   : > { %v381_v44 = vshll.u32 %v377_v40, 1  ;;  %v676_v45 = vshrl.u32 %v675_v39, 31  ;;  %v677_v46 = vshll.u32 %v673_v43, 1  ;;  %v679_v47 = vshll.u32 %v675_v39, 1 }
 0x104   : > { %v387_v48 = vadd.s32 1, %v383_v42  ;;  %1408 = vrcp.f32 %v758_v32 }
 0x105   : > { %v382_v49 = vor.u32 %v381_v44, %v380_v41  ;;  %v678_v50 = vor.u32 %v677_v46, %v676_v45  ;;  %v683_v51 = vadd.s32 1, %v679_v47  ;;  %v742_v45 = vstv %s1822_s18 }
 0x107   : > { %vm384_vm2 = vcmp.ge.u32.totalorder %v382_v49, %v1702_v11  ;;  %v385_v53 = vsub.s32 %v382_v49, %v1702_v11  ;;  %vm680_vm3 = vcmp.ge.u32.totalorder %v678_v50, %v1702_v11  ;;  %v681_v54 = vsub.s32 %v678_v50, %v1702_v11 }
 0x108   : > { %v388_v55 = vsel %vm384_vm2, %v387_v48, %v383_v42  ;;  %v684_v56 = vsel %vm680_vm3, %v683_v51, %v679_v47  ;;  %v1840_v51 = vadd.s32 8, %v1805_v52 }
 0x109   : > { %v386_v58 = vsel %vm384_vm2, %v385_v53, %v382_v49  ;;  %v389_v59 = vshrl.u32 %v388_v55, 31  ;;  %v392_v60 = vshll.u32 %v388_v55, 1  ;;  %v682_v61 = vsel %vm680_vm3, %v681_v54, %v678_v50 }
 0x10a   : > { %v390_v63 = vshll.u32 %v386_v58, 1  ;;  %v685_v3 = vshrl.u32 %v684_v56, 31  ;;  %v686_v4 = vshll.u32 %v682_v61, 1  ;;  %v688_v5 = vshll.u32 %v684_v56, 1 }
 0x10b   : > { %v396_v6 = vadd.s32 1, %v392_v60  ;;  %v1837_v50 = vadd.s32 %v742_v45, %v1695_v2  ;;  %v798_v7 = vcvt.s32.f32 %v1840_v51 }
 0x10c   : > { %v391_v8 = vor.u32 %v390_v63, %v389_v59  ;;  %v687_v9 = vor.u32 %v686_v4, %v685_v3  ;;  %v692_v10 = vadd.s32 1, %v688_v5  ;;  %v1843_v63 = vadd.s32 %v742_v45, %v1692_v1 }
 0x10d   : > { %v746_v3 = vstv %s1834_s20  ;;  %v797_v4 = vcvt.s32.f32 %v1805_v52  ;;  %v1858_v1 = vadd.s32 40, %v1805_v52  ;;  %v1896_v45 = vadd.s32 88, %v1805_v52 }
 0x10e   : > { %vm393_vm4 = vcmp.ge.u32.totalorder %v391_v8, %v1702_v11  ;;  %v394_v12 = vsub.s32 %v391_v8, %v1702_v11  ;;  %vm689_vm5 = vcmp.ge.u32.totalorder %v687_v9, %v1702_v11  ;;  %v690_v13 = vsub.s32 %v687_v9, %v1702_v11 }
 0x10f   : > { %v397_v14 = vsel %vm393_vm4, %v396_v6, %v392_v60  ;;  %v693_v15 = vsel %vm689_vm5, %v692_v10, %v688_v5  ;;  %v1855_v10 = vadd.s32 32, %v1805_v52  ;;  %vm1876_vm12 = vcmp.eq.s32.totalorder %v746_v3, 1 }
 0x110   : > { %v395_v16 = vsel %vm393_vm4, %v394_v12, %v391_v8  ;;  %v398_v17 = vshrl.u32 %v397_v14, 31  ;;  %v401_v18 = vshll.u32 %v397_v14, 1  ;;  %v691_v19 = vsel %vm689_vm5, %v690_v13, %v687_v9 }
 0x111   : > { %v399_v20 = vshll.u32 %v395_v16, 1  ;;  %v694_v21 = vshrl.u32 %v693_v15, 31  ;;  %v695_v22 = vshll.u32 %v691_v19, 1  ;;  %v697_v23 = vshll.u32 %v693_v15, 1 }
 0x112   : > { %v405_v24 = vadd.s32 1, %v401_v18  ;;  %v1849_v8 = vadd.s32 16, %v1805_v52  ;;  %v1852_v9 = vadd.s32 24, %v1805_v52  ;;  %v1865_v16 = vadd.s32 48, %v1805_v52 }
 0x113   : > { %v400_v25 = vor.u32 %v399_v20, %v398_v17  ;;  %v696_v26 = vor.u32 %v695_v22, %v694_v21  ;;  %v701_v27 = vadd.s32 1, %v697_v23  ;;  %v1868_v17 = vadd.s32 56, %v1805_v52 }
 0x115   : > { %vm402_vm6 = vcmp.ge.u32.totalorder %v400_v25, %v1702_v11  ;;  %v403_v28 = vsub.s32 %v400_v25, %v1702_v11  ;;  %vm698_vm7 = vcmp.ge.u32.totalorder %v696_v26, %v1702_v11  ;;  %v699_v29 = vsub.s32 %v696_v26, %v1702_v11 }
 0x116   : > { %v406_v30 = vsel %vm402_vm6, %v405_v24, %v401_v18  ;;  %v702_v31 = vsel %vm698_vm7, %v701_v27, %v697_v23  ;;  %v1870_v18 = vpop.eup %1408 }
 0x117   : > { %v404_v33 = vsel %vm402_vm6, %v403_v28, %v400_v25  ;;  %v407_v34 = vshrl.u32 %v406_v30, 31  ;;  %v410_v35 = vshll.u32 %v406_v30, 1  ;;  %v700_v36 = vsel %vm698_vm7, %v699_v29, %v696_v26 }
 0x118   : > { %v408_v37 = vshll.u32 %v404_v33, 1  ;;  %v703_v38 = vshrl.u32 %v702_v31, 31  ;;  %v704_v39 = vshll.u32 %v700_v36, 1  ;;  %v706_v40 = vshll.u32 %v702_v31, 1 }
 0x119   : > { %v414_v41 = vadd.s32 1, %v410_v35  ;;  %v799_v28 = vcvt.s32.f32 %v1849_v8  ;;  %v800_v29 = vcvt.s32.f32 %v1852_v9  ;;  %v801_v30 = vcvt.s32.f32 %v1855_v10 }
 0x11a   : > { %v409_v42 = vor.u32 %v408_v37, %v407_v34  ;;  %v705_v43 = vor.u32 %v704_v39, %v703_v38  ;;  %v710_v44 = vadd.s32 1, %v706_v40  ;;  %v802_v34 = vcvt.s32.f32 %v1858_v1 }
 0x11b   : > { %v1883_v38 = vadd.s32 64, %v1805_v52  ;;  %v1886_v39 = vadd.s32 72, %v1805_v52 }
 0x11c   : > { %vm411_vm8 = vcmp.ge.u32.totalorder %v409_v42, %v1702_v11  ;;  %v412_v46 = vsub.s32 %v409_v42, %v1702_v11  ;;  %vm707_vm9 = vcmp.ge.u32.totalorder %v705_v43, %v1702_v11  ;;  %v708_v47 = vsub.s32 %v705_v43, %v1702_v11 }
 0x11d   : > { %v415_v48 = vsel %vm411_vm8, %v414_v41, %v410_v35  ;;  %v711_v49 = vsel %vm707_vm9, %v710_v44, %v706_v40  ;;  %v1893_v44 = vadd.s32 80, %v1805_v52  ;;  %v1960_v35 = vadd.s32 200, %v1805_v52 }
 0x11e   : > { %v413_v53 = vsel %vm411_vm8, %v412_v46, %v409_v42  ;;  %v416_v54 = vshrl.u32 %v415_v48, 31  ;;  %v419_v55 = vshll.u32 %v415_v48, 1  ;;  %v709_v56 = vsel %vm707_vm9, %v708_v47, %v705_v43 }
 0x11f   : > { %v417_v57 = vshll.u32 %v413_v53, 1  ;;  %v712_v58 = vshrl.u32 %v711_v49, 31  ;;  %v713_v59 = vshll.u32 %v709_v56, 1  ;;  %v715_v60 = vshll.u32 %v711_v49, 1 }
 0x120   : > { %v423_v61 = vadd.s32 1, %v419_v55 }
 0x121   : > { %v418_v2 = vor.u32 %v417_v57, %v416_v54  ;;  %v714_v5 = vor.u32 %v713_v59, %v712_v58  ;;  %v719_v6 = vadd.s32 1, %v715_v60  ;;  %v1901_v57 = vadd.s32 96, %v1805_v52 }
 0x122   : > { %v1904_v58 = vadd.s32 104, %v1805_v52  ;;  %v1907_v59 = vadd.s32 112, %v1805_v52 }
 0x123   : > { %vm420_vm10 = vcmp.ge.u32.totalorder %v418_v2, %v1702_v11  ;;  %v421_v12 = vsub.s32 %v418_v2, %v1702_v11  ;;  %vm716_vm11 = vcmp.ge.u32.totalorder %v714_v5, %v1702_v11  ;;  %v717_v13 = vsub.s32 %v714_v5, %v1702_v11 }
 0x124   : > { %v424_v14 = vsel %vm420_vm10, %v423_v61, %v419_v55  ;;  %v720_v15 = vsel %vm716_vm11, %v719_v6, %v715_v60  ;;  %v1910_v60 = vadd.s32 120, %v1805_v52 }
 0x125   : > { %v422_v19 = vsel %vm420_vm10, %v421_v12, %v418_v2  ;;  %v425_v20 = vshrl.u32 %v424_v14, 31  ;;  %v428_v21 = vshll.u32 %v424_v14, 1  ;;  %v718_v22 = vsel %vm716_vm11, %v717_v13, %v714_v5 }
 0x126   : > { %v426_v23 = vshll.u32 %v422_v19, 1  ;;  %v721_v24 = vshrl.u32 %v720_v15, 31  ;;  %v722_v25 = vshll.u32 %v718_v22, 1  ;;  %v724_v26 = vshll.u32 %v720_v15, 1 }
 0x127   : > { %v432_v27 = vadd.s32 1, %v428_v21  ;;  %v1913_v2 = vadd.s32 128, %v1805_v52  ;;  %v1916_v5 = vadd.s32 136, %v1805_v52  ;;  %v1921_v13 = vadd.s32 144, %v1805_v52 }
 0x128   : > { %v427_v31 = vor.u32 %v426_v23, %v425_v20  ;;  %v723_v32 = vor.u32 %v722_v25, %v721_v24  ;;  %v728_v33 = vadd.s32 1, %v724_v26  ;;  %v1924_v14 = vadd.s32 152, %v1805_v52 }
 0x12a   : > { %vm429_vm13 = vcmp.ge.u32.totalorder %v427_v31, %v1702_v11  ;;  %v430_v40 = vsub.s32 %v427_v31, %v1702_v11  ;;  %vm725_vm14 = vcmp.ge.u32.totalorder %v723_v32, %v1702_v11  ;;  %v726_v41 = vsub.s32 %v723_v32, %v1702_v11 }
 0x12b   : > { %v433_v42 = vsel %vm429_vm13, %v432_v27, %v428_v21  ;;  %v729_v43 = vsel %vm725_vm14, %v728_v33, %v724_v26 }
 0x12c   : > { %v431_v46 = vsel %vm429_vm13, %v430_v40, %v427_v31  ;;  %v434_v47 = vshrl.u32 %v433_v42, 31  ;;  %v727_v48 = vsel %vm725_vm14, %v726_v41, %v723_v32  ;;  %v730_v49 = vshrl.u32 %v729_v43, 31 }
 0x12d   : > { %v435_v53 = vshll.u32 %v431_v46, 1  ;;  %v731_v54 = vshll.u32 %v727_v48, 1  ;;  %v1945_v42 = vadd.s32 160, %v1805_v52  ;;  %v1948_v43 = vadd.s32 168, %v1805_v52 }
 0x12e   : > { %v1951_v46 = vadd.s32 176, %v1805_v52 }
 0x12f   : > { %v436_v61 = vor.u32 %v435_v53, %v434_v47  ;;  %v732_v3 = vor.u32 %v731_v54, %v730_v49  ;;  %v1963_v49 = vadd.s32 208, %v1805_v52  ;;  %v1966_v53 = vadd.s32 216, %v1805_v52 }
 0x130   : > { %v1969_v54 = vadd.s32 224, %v1805_v52 }
 0x131   : > { %vm438_vm15 = vcmp.ge.u32.totalorder %v436_v61, %v1702_v11  ;;  %v439_v15 = vsub.s32 %v436_v61, %v1702_v11  ;;  %vm734_vm0 = vcmp.ge.u32.totalorder %v732_v3, %v1702_v11  ;;  %v735_v19 = vsub.s32 %v732_v3, %v1702_v11 }
 0x133   : > { %v440_v24 = vsel %vm438_vm15, %v439_v15, %v436_v61  ;;  %v736_v25 = vsel %vm734_vm0, %v735_v19, %v732_v3  ;;  %v1972_v61 = vadd.s32 232, %v1805_v52  ;;  %v1975_v3 = vadd.s32 240, %v1805_v52 }
 0x134   : > { %v748_v31 = vsel %vm1876_vm12, %v1843_v63, %v440_v24  ;;  %v749_v11 = vsel %vm1876_vm12, %v1837_v50, %v736_v25  ;;  %v1954_v63 = vadd.s32 184, %v1805_v52  ;;  %v1957_v50 = vadd.s32 192, %v1805_v52 }
 0x135   : > { %v754_v40 = vmul.u32 255, %v748_v31  ;;  %v755_v41 = vmul.u32 255, %v749_v11  ;;  %v1978_v15 = vadd.s32 248, %v1805_v52 }
 0x137   : > { %v756_v47 = vcvt.s32.f32 %v754_v40  ;;  %v757_v48 = vcvt.s32.f32 %v755_v41 }
 0x139   : > { %v760_v19 = vmul.f32 %v1870_v18, %v756_v47  ;;  %v761_v24 = vmul.f32 %v1870_v18, %v757_v48 }
 0x13b   : > { %v1988_v33 = vmin.f32 %v760_v19, 255.0  ;;  %v1990_v32 = vmin.f32 %v761_v24, 255.0 }
 0x13d   : > { %v830_v0 = vsub.f32 %v1990_v32, %v797_v4  ;;  %v832_v19 = vsub.f32 %v1990_v32, %v798_v7  ;;  %v829_v24 = vsub.f32 %v1988_v33, %v797_v4  ;;  %v831_v31 = vsub.f32 %v1988_v33, %v798_v7 }
 0x13e   : > { %v834_v40 = vsub.f32 %v1990_v32, %v799_v28  ;;  %v836_v11 = vsub.f32 %v1990_v32, %v800_v29  ;;  %v833_v48 = vsub.f32 %v1988_v33, %v799_v28  ;;  %v835_v4 = vsub.f32 %v1988_v33, %v800_v29 }
 0x13f   : > { %v894_v18 = vand.u32 2147483647, %v830_v0  ;;  %v896_v51 = vand.u32 2147483647, %v832_v19  ;;  %v893_v47 = vand.u32 2147483647, %v829_v24  ;;  %v838_v7 = vsub.f32 %v1990_v32, %v801_v30 }
 0x140   : > { %v895_v41 = vand.u32 2147483647, %v831_v31  ;;  %v898_v25 = vand.u32 2147483647, %v834_v40  ;;  %v900_v27 = vand.u32 2147483647, %v836_v11  ;;  %v840_v8 = vsub.f32 %v1990_v32, %v802_v34 }
 0x141   : > { %v958_v26 = vsub.f32 1.0, %v894_v18  ;;  %v960_v28 = vsub.f32 1.0, %v896_v51  ;;  %v957_v23 = vsub.f32 1.0, %v893_v47  ;;  %v897_v9 = vand.u32 2147483647, %v833_v48 }
 0x142   : > { %v959_v22 = vsub.f32 1.0, %v895_v41  ;;  %v962_v29 = vsub.f32 1.0, %v898_v25  ;;  %v964_v0 = vsub.f32 1.0, %v900_v27  ;;  %v899_v19 = vand.u32 2147483647, %v835_v4 }
 0x143   : > { %v1022_v24 = vmax.f32 %v958_v26, 0.0  ;;  %v1024_v21 = vmax.f32 %v960_v28, 0.0  ;;  %v1021_v20 = vmax.f32 %v957_v23, 0.0  ;;  %v961_v12 = vsub.f32 1.0, %v897_v9 }
 0x144   : > { %v1023_v6 = vmax.f32 %v959_v22, 0.0  ;;  %v1026_v31 = vmax.f32 %v962_v29, 0.0  ;;  %v1028_v40 = vmax.f32 %v964_v0, 0.0  ;;  %v963_v11 = vsub.f32 1.0, %v899_v19 }
 0x145   : > { %v1295_v56 = vpack.c.bf16 %v1024_v21, %v1022_v24  ;;  %v1025_v55 = vmax.f32 %v961_v12, 0.0  ;;  %v902_v37 = vand.u32 2147483647, %v838_v7  ;;  %v904_v36 = vand.u32 2147483647, %v840_v8 }
 0x146   : > { %v1297_v18 = vpack.c.bf16 %v1023_v6, %v1021_v20  ;;  %v1299_v51 = vpack.c.bf16 %v1028_v40, %v1026_v31  ;;  %v1027_v47 = vmax.f32 %v963_v11, 0.0  ;;  %v837_v27 = vsub.f32 %v1988_v33, %v801_v30 }
 0x147   : > { %1296 = vmatprep.subr.bf16.mxu0 %v1295_v56  ;;  %v966_v26 = vsub.f32 1.0, %v902_v37  ;;  %v968_v25 = vsub.f32 1.0, %v904_v36  ;;  %v839_v22 = vsub.f32 %v1988_v33, %v802_v34  ;;  %v2258_v23 = vcvt.s32.f32 %v1865_v16 }
 0x148   : > { %1298 = vmatpush1.bf16.msra.mxu0 %v1297_v18  ;;  %v1301_v21 = vpack.c.bf16 %v1027_v47, %v1025_v55  ;;  %v901_v6 = vand.u32 2147483647, %v837_v27  ;;  %v2259_v20 = vcvt.s32.f32 %v1868_v17  ;;  %v2262_v29 = vcvt.s32.f32 %v1883_v38 }
 0x149   : > { %v842_v12 = vsub.f32 %v1990_v32, %v2258_v23  ;;  %v2260_v30 = vmov %v2258_v23  ;;  %1300 = vmatprep.subr.bf16.mxu0 %v1299_v51  ;;  %v1030_v36 = vmax.f32 %v966_v26, 0.0  ;;  %v1032_v1 = vmax.f32 %v968_v25, 0.0 }
 0x14a   : > { %v844_v10 = vsub.f32 %v1990_v32, %v2259_v20  ;;  %v841_v37 = vsub.f32 %v1988_v33, %v2260_v30  ;;  %v903_v56 = vand.u32 2147483647, %v839_v22  ;;  %v965_v41 = vsub.f32 1.0, %v901_v6 }
 0x14b   : > { %v906_v34 = vand.u32 2147483647, %v842_v12  ;;  %v2261_v4 = vmov %v2259_v20  ;;  %v1303_v8 = vpack.c.bf16 %v1032_v1, %v1030_v36  ;;  %v846_v16 = vsub.f32 %v1990_v32, %v2262_v29 }
 0x14c   : > { %v908_v48 = vand.u32 2147483647, %v844_v10  ;;  %v843_v55 = vsub.f32 %v1988_v33, %v2261_v4  ;;  %v905_v7 = vand.u32 2147483647, %v841_v37  ;;  %v967_v28 = vsub.f32 1.0, %v903_v56  ;;  %1302 = vmatpush1.bf16.msra.mxu0 %v1301_v21 }
 0x14d   : > { %v970_v9 = vsub.f32 1.0, %v906_v34  ;;  %v1029_v0 = vmax.f32 %v965_v41, 0.0  ;;  %1304 = vmatprep.subr.bf16.mxu0 %v1303_v8  ;;  %v2263_v17 = vcvt.s32.f32 %v1886_v39  ;;  %v910_v51 = vand.u32 2147483647, %v846_v16 }
 0x14e   : > { %v972_v19 = vsub.f32 1.0, %v908_v48  ;;  %v907_v24 = vand.u32 2147483647, %v843_v55  ;;  %v969_v31 = vsub.f32 1.0, %v905_v7  ;;  %v1031_v40 = vmax.f32 %v967_v28, 0.0 }
 0x14f   : > { %v1034_v11 = vmax.f32 %v970_v9, 0.0  ;;  %v848_v18 = vsub.f32 %v1990_v32, %v2263_v17  ;;  %v2264_v25 = vmov %v2262_v29  ;;  %v974_v21 = vsub.f32 1.0, %v910_v51 }
 0x150   : > { %v1036_v47 = vmax.f32 %v972_v19, 0.0  ;;  %v971_v27 = vsub.f32 1.0, %v907_v24  ;;  %v1033_v26 = vmax.f32 %v969_v31, 0.0  ;;  %v845_v22 = vsub.f32 %v1988_v33, %v2264_v25 }
 0x151   : > { %v1305_v23 = vpack.c.bf16 %v1031_v40, %v1029_v0  ;;  %v912_v12 = vand.u32 2147483647, %v848_v18  ;;  %v2265_v6 = vmov %v2263_v17  ;;  %v2266_v36 = vcvt.s32.f32 %v1893_v44 }
 0x152   : > { %v847_v20 = vsub.f32 %v1988_v33, %v2265_v6  ;;  %v1307_v10 = vpack.c.bf16 %v1036_v47, %v1034_v11  ;;  %v1035_v30 = vmax.f32 %v971_v27, 0.0  ;;  %v909_v37 = vand.u32 2147483647, %v845_v22 }
 0x153   : > { %v850_v1 = vsub.f32 %v1990_v32, %v2266_v36  ;;  %1306 = vmatpush1.bf16.msra.mxu0 %v1305_v23  ;;  %v976_v56 = vsub.f32 1.0, %v912_v12  ;;  %v1038_v34 = vmax.f32 %v974_v21, 0.0  ;;  %v2267_v41 = vcvt.s32.f32 %v1896_v45 }
 0x154   : > { %v911_v38 = vand.u32 2147483647, %v847_v20  ;;  %1308 = vmatprep.subr.bf16.mxu0 %v1307_v10  ;;  %v1309_v4 = vpack.c.bf16 %v1035_v30, %v1033_v26  ;;  %v973_v39 = vsub.f32 1.0, %v909_v37  ;;  %v2268_v7 = vmov %v2266_v36 }
 0x155   : > { %v852_v48 = vsub.f32 %v1990_v32, %v2267_v41  ;;  %v914_v55 = vand.u32 2147483647, %v850_v1  ;;  %v849_v8 = vsub.f32 %v1988_v33, %v2268_v7  ;;  %v1040_v28 = vmax.f32 %v976_v56, 0.0 }
 0x156   : > { %v975_v9 = vsub.f32 1.0, %v911_v38  ;;  %v2269_v16 = vmov %v2267_v41  ;;  %v1037_v19 = vmax.f32 %v973_v39, 0.0  ;;  %v2270_v40 = vcvt.s32.f32 %v1901_v57 }
 0x157   : > { %v916_v29 = vand.u32 2147483647, %v852_v48  ;;  %v851_v0 = vsub.f32 %v1988_v33, %v2269_v16  ;;  %v978_v24 = vsub.f32 1.0, %v914_v55  ;;  %v913_v31 = vand.u32 2147483647, %v849_v8  ;;  %1310 = vmatpush1.bf16.msra.mxu0 %v1309_v4 }
 0x158   : > { %v854_v11 = vsub.f32 %v1990_v32, %v2270_v40  ;;  %v1311_v17 = vpack.c.bf16 %v1040_v28, %v1038_v34  ;;  %v1039_v18 = vmax.f32 %v975_v9, 0.0  ;;  %v2271_v26 = vcvt.s32.f32 %v1904_v58 }
 0x159   : > { %v980_v44 = vsub.f32 1.0, %v916_v29  ;;  %v915_v51 = vand.u32 2147483647, %v851_v0  ;;  %v1042_v47 = vmax.f32 %v978_v24, 0.0  ;;  %v977_v27 = vsub.f32 1.0, %v913_v31 }
 0x15a   : > { %v856_v45 = vsub.f32 %v1990_v32, %v2271_v26  ;;  %v918_v25 = vand.u32 2147483647, %v854_v11  ;;  %1312 = vmatprep.subr.bf16.mxu0 %v1311_v17  ;;  %v1313_v22 = vpack.c.bf16 %v1039_v18, %v1037_v19  ;;  %v2272_v21 = vmov %v2270_v40 }
 0x15b   : > { %v1044_v23 = vmax.f32 %v980_v44, 0.0  ;;  %v979_v12 = vsub.f32 1.0, %v915_v51  ;;  %v853_v6 = vsub.f32 %v1988_v33, %v2272_v21  ;;  %v1041_v20 = vmax.f32 %v977_v27, 0.0 }
 0x15c   : > { %v920_v10 = vand.u32 2147483647, %v856_v45  ;;  %v982_v30 = vsub.f32 1.0, %v918_v25  ;;  %v2273_v37 = vmov %v2271_v26  ;;  %1314 = vmatpush1.bf16.msra.mxu0 %v1313_v22  ;;  %v2274_v38 = vcvt.s32.f32 %v1907_v59 }
 0x15d   : > { %v855_v36 = vsub.f32 %v1988_v33, %v2273_v37  ;;  %v1315_v1 = vpack.c.bf16 %v1044_v23, %v1042_v47  ;;  %v1043_v56 = vmax.f32 %v979_v12, 0.0  ;;  %v917_v34 = vand.u32 2147483647, %v853_v6 }
 0x15e   : > { %v858_v41 = vsub.f32 %v1990_v32, %v2274_v38  ;;  %v984_v48 = vsub.f32 1.0, %v920_v10  ;;  %v1046_v4 = vmax.f32 %v982_v30, 0.0  ;;  %v2275_v39 = vcvt.s32.f32 %v1910_v60 }
 0x15f   : > { %v919_v57 = vand.u32 2147483647, %v855_v36  ;;  %1316 = vmatprep.subr.bf16.mxu0 %v1315_v1  ;;  %v1317_v7 = vpack.c.bf16 %v1043_v56, %v1041_v20  ;;  %v981_v58 = vsub.f32 1.0, %v917_v34  ;;  %v2276_v28 = vmov %v2274_v38 }
 0x160   : > { %v860_v55 = vsub.f32 %v1990_v32, %v2275_v39  ;;  %v922_v8 = vand.u32 2147483647, %v858_v41  ;;  %v857_v9 = vsub.f32 %v1988_v33, %v2276_v28  ;;  %v1048_v29 = vmax.f32 %v984_v48, 0.0 }
 0x161   : > { %v983_v16 = vsub.f32 1.0, %v919_v57  ;;  %v2277_v19 = vmov %v2275_v39  ;;  %1318 = vmatpush1.bf16.msra.mxu0 %v1317_v7  ;;  %v1045_v31 = vmax.f32 %v981_v58, 0.0  ;;  %v2278_v17 = vcvt.s32.f32 %v1913_v2 }
 0x162   : > { %v924_v0 = vand.u32 2147483647, %v860_v55  ;;  %v859_v24 = vsub.f32 %v1988_v33, %v2277_v19  ;;  %v986_v40 = vsub.f32 1.0, %v922_v8  ;;  %v921_v11 = vand.u32 2147483647, %v857_v9 }
 0x163   : > { %v862_v18 = vsub.f32 %v1990_v32, %v2278_v17  ;;  %v1319_v44 = vpack.c.bf16 %v1048_v29, %v1046_v4  ;;  %v1047_v51 = vmax.f32 %v983_v16, 0.0  ;;  %v2279_v45 = vcvt.s32.f32 %v1916_v5 }
 0x164   : > { %v988_v59 = vsub.f32 1.0, %v924_v0  ;;  %v923_v47 = vand.u32 2147483647, %v859_v24  ;;  %v1050_v27 = vmax.f32 %v986_v40, 0.0  ;;  %v985_v26 = vsub.f32 1.0, %v921_v11 }
 0x165   : > { %v864_v60 = vsub.f32 %v1990_v32, %v2279_v45  ;;  %v926_v25 = vand.u32 2147483647, %v862_v18  ;;  %1320 = vmatprep.subr.bf16.mxu0 %v1319_v44  ;;  %v1321_v22 = vpack.c.bf16 %v1047_v51, %v1045_v31  ;;  %v2280_v21 = vmov %v2278_v17 }
 0x166   : > { %v1052_v23 = vmax.f32 %v988_v59, 0.0  ;;  %v987_v12 = vsub.f32 1.0, %v923_v47  ;;  %v861_v6 = vsub.f32 %v1988_v33, %v2280_v21  ;;  %v1049_v20 = vmax.f32 %v985_v26, 0.0 }
 0x167   : > { %v928_v10 = vand.u32 2147483647, %v864_v60  ;;  %v990_v30 = vsub.f32 1.0, %v926_v25  ;;  %v2281_v37 = vmov %v2279_v45  ;;  %1322 = vmatpush1.bf16.msra.mxu0 %v1321_v22  ;;  %v2282_v38 = vcvt.s32.f32 %v1921_v13 }
 0x168   : > { %v863_v36 = vsub.f32 %v1988_v33, %v2281_v37  ;;  %v1323_v1 = vpack.c.bf16 %v1052_v23, %v1050_v27  ;;  %v1051_v56 = vmax.f32 %v987_v12, 0.0  ;;  %v925_v34 = vand.u32 2147483647, %v861_v6 }
 0x169   : > { %v866_v41 = vsub.f32 %v1990_v32, %v2282_v38  ;;  %v992_v48 = vsub.f32 1.0, %v928_v10  ;;  %v1054_v4 = vmax.f32 %v990_v30, 0.0  ;;  %v2283_v57 = vcvt.s32.f32 %v1924_v14 }
 0x16a   : > { %v927_v2 = vand.u32 2147483647, %v863_v36  ;;  %1324 = vmatprep.subr.bf16.mxu0 %v1323_v1  ;;  %v1325_v55 = vpack.c.bf16 %v1051_v56, %v1049_v20  ;;  %v989_v5 = vsub.f32 1.0, %v925_v34  ;;  %v2284_v58 = vmov %v2282_v38 }
 0x16b   : > { %v868_v39 = vsub.f32 %v1990_v32, %v2283_v57  ;;  %v930_v7 = vand.u32 2147483647, %v866_v41  ;;  %v865_v8 = vsub.f32 %v1988_v33, %v2284_v58  ;;  %v1056_v28 = vmax.f32 %v992_v48, 0.0 }
 0x16c   : > { %v991_v9 = vsub.f32 1.0, %v927_v2  ;;  %v2285_v16 = vmov %v2283_v57  ;;  %1326 = vmatpush1.bf16.msra.mxu0 %v1325_v55  ;;  %v1053_v19 = vmax.f32 %v989_v5, 0.0  ;;  %v2286_v40 = vcvt.s32.f32 %v1945_v42 }
 0x16d   : > { %v932_v29 = vand.u32 2147483647, %v868_v39  ;;  %v867_v0 = vsub.f32 %v1988_v33, %v2285_v16  ;;  %v994_v24 = vsub.f32 1.0, %v930_v7  ;;  %v929_v31 = vand.u32 2147483647, %v865_v8 }
 0x16e   : > { %v870_v11 = vsub.f32 %v1990_v32, %v2286_v40  ;;  %v1327_v17 = vpack.c.bf16 %v1056_v28, %v1054_v4  ;;  %v1055_v18 = vmax.f32 %v991_v9, 0.0  ;;  %v2287_v47 = vcvt.s32.f32 %v1948_v43 }
 0x16f   : > { %v996_v13 = vsub.f32 1.0, %v932_v29  ;;  %v931_v44 = vand.u32 2147483647, %v867_v0  ;;  %v1058_v51 = vmax.f32 %v994_v24, 0.0  ;;  %v993_v59 = vsub.f32 1.0, %v929_v31 }
 0x170   : > { %v872_v14 = vsub.f32 %v1990_v32, %v2287_v47  ;;  %v934_v27 = vand.u32 2147483647, %v870_v11  ;;  %1328 = vmatprep.subr.bf16.mxu0 %v1327_v17  ;;  %v1329_v26 = vpack.c.bf16 %v1055_v18, %v1053_v19  ;;  %v2288_v25 = vmov %v2286_v40 }
 0x171   : > { %v1060_v45 = vmax.f32 %v996_v13, 0.0  ;;  %v995_v60 = vsub.f32 1.0, %v931_v44  ;;  %v869_v22 = vsub.f32 %v1988_v33, %v2288_v25  ;;  %v1057_v23 = vmax.f32 %v993_v59, 0.0 }
 0x172   : > { %v936_v12 = vand.u32 2147483647, %v872_v14  ;;  %v998_v21 = vsub.f32 1.0, %v934_v27  ;;  %v2289_v6 = vmov %v2287_v47  ;;  %1330 = vmatpush1.bf16.msra.mxu0 %v1329_v26  ;;  %v2290_v36 = vcvt.s32.f32 %v1951_v46 }
 0x173   : > { %v871_v20 = vsub.f32 %v1988_v33, %v2289_v6  ;;  %v1331_v10 = vpack.c.bf16 %v1060_v45, %v1058_v51  ;;  %v1059_v30 = vmax.f32 %v995_v60, 0.0  ;;  %v933_v37 = vand.u32 2147483647, %v869_v22 }
 0x174   : > { %v874_v1 = vsub.f32 %v1990_v32, %v2290_v36  ;;  %v1000_v56 = vsub.f32 1.0, %v936_v12  ;;  %v1062_v34 = vmax.f32 %v998_v21, 0.0  ;;  %v2291_v38 = vcvt.s32.f32 %v1954_v63 }
 0x175   : > { %v935_v42 = vand.u32 2147483647, %v871_v20  ;;  %1332 = vmatprep.subr.bf16.mxu0 %v1331_v10  ;;  %v1333_v48 = vpack.c.bf16 %v1059_v30, %v1057_v23  ;;  %v997_v43 = vsub.f32 1.0, %v933_v37  ;;  %v2292_v2 = vmov %v2290_v36 }
 0x176   : > { %v876_v41 = vsub.f32 %v1990_v32, %v2291_v38  ;;  %v938_v4 = vand.u32 2147483647, %v874_v1  ;;  %v873_v57 = vsub.f32 %v1988_v33, %v2292_v2  ;;  %v1064_v39 = vmax.f32 %v1000_v56, 0.0 }
 0x177   : > { %v999_v55 = vsub.f32 1.0, %v935_v42  ;;  %v2293_v7 = vmov %v2291_v38  ;;  %1334 = vmatpush1.bf16.msra.mxu0 %v1333_v48  ;;  %v1061_v8 = vmax.f32 %v997_v43, 0.0  ;;  %v2294_v29 = vcvt.s32.f32 %v1957_v50 }
 0x178   : > { %v940_v5 = vand.u32 2147483647, %v876_v41  ;;  %v875_v58 = vsub.f32 %v1988_v33, %v2293_v7  ;;  %v1002_v28 = vsub.f32 1.0, %v938_v4  ;;  %v937_v9 = vand.u32 2147483647, %v873_v57 }
 0x179   : > { %v878_v16 = vsub.f32 %v1990_v32, %v2294_v29  ;;  %v1335_v0 = vpack.c.bf16 %v1064_v39, %v1062_v34  ;;  %v1063_v19 = vmax.f32 %v999_v55, 0.0  ;;  %v2295_v11 = vcvt.s32.f32 %v1960_v35 }
 0x17a   : > { %v1004_v46 = vsub.f32 1.0, %v940_v5  ;;  %v939_v24 = vand.u32 2147483647, %v875_v58  ;;  %v1066_v31 = vmax.f32 %v1002_v28, 0.0  ;;  %v1001_v40 = vsub.f32 1.0, %v937_v9 }
 0x17b   : > { %v880_v63 = vsub.f32 %v1990_v32, %v2295_v11  ;;  %v942_v17 = vand.u32 2147483647, %v878_v16  ;;  %1336 = vmatprep.subr.bf16.mxu0 %v1335_v0  ;;  %v1337_v18 = vpack.c.bf16 %v1063_v19, %v1061_v8  ;;  %v2296_v51 = vmov %v2294_v29 }
 0x17c   : > { %v1068_v13 = vmax.f32 %v1004_v46, 0.0  ;;  %v1003_v44 = vsub.f32 1.0, %v939_v24  ;;  %v877_v59 = vsub.f32 %v1988_v33, %v2296_v51  ;;  %v1065_v47 = vmax.f32 %v1001_v40, 0.0 }
 0x17d   : > { %v944_v14 = vand.u32 2147483647, %v880_v63  ;;  %v1006_v27 = vsub.f32 1.0, %v942_v17  ;;  %v2297_v26 = vmov %v2295_v11  ;;  %1338 = vmatpush1.bf16.msra.mxu0 %v1337_v18  ;;  %v2298_v23 = vcvt.s32.f32 %v1963_v49 }
 0x17e   : > { %v879_v45 = vsub.f32 %v1988_v33, %v2297_v26  ;;  %v1339_v60 = vpack.c.bf16 %v1068_v13, %v1066_v31  ;;  %v1067_v25 = vmax.f32 %v1003_v44, 0.0  ;;  %v941_v22 = vand.u32 2147483647, %v877_v59 }
 0x17f   : > { %v882_v12 = vsub.f32 %v1990_v32, %v2298_v23  ;;  %v1008_v21 = vsub.f32 1.0, %v944_v14  ;;  %v1070_v6 = vmax.f32 %v1006_v27, 0.0  ;;  %v2299_v20 = vcvt.s32.f32 %v1966_v53 }
 0x180   : > { %v943_v50 = vand.u32 2147483647, %v879_v45  ;;  %1340 = vmatprep.subr.bf16.mxu0 %v1339_v60  ;;  %v1341_v30 = vpack.c.bf16 %v1067_v25, %v1065_v47  ;;  %v1005_v35 = vsub.f32 1.0, %v941_v22  ;;  %v2300_v36 = vmov %v2298_v23 }
 0x181   : > { %v884_v10 = vsub.f32 %v1990_v32, %v2299_v20  ;;  %v946_v37 = vand.u32 2147483647, %v882_v12  ;;  %v881_v1 = vsub.f32 %v1988_v33, %v2300_v36  ;;  %v1072_v56 = vmax.f32 %v1008_v21, 0.0 }
 0x182   : > { %v1007_v34 = vsub.f32 1.0, %v943_v50  ;;  %v2301_v38 = vmov %v2299_v20  ;;  %1342 = vmatpush1.bf16.msra.mxu0 %v1341_v30  ;;  %v1069_v48 = vmax.f32 %v1005_v35, 0.0  ;;  %v2302_v2 = vcvt.s32.f32 %v1969_v54 }
 0x183   : > { %v948_v42 = vand.u32 2147483647, %v884_v10  ;;  %v883_v41 = vsub.f32 %v1988_v33, %v2301_v38  ;;  %v1010_v43 = vsub.f32 1.0, %v946_v37  ;;  %v945_v4 = vand.u32 2147483647, %v881_v1 }
 0x184   : > { %v886_v57 = vsub.f32 %v1990_v32, %v2302_v2  ;;  %v1343_v39 = vpack.c.bf16 %v1072_v56, %v1070_v6  ;;  %v1071_v55 = vmax.f32 %v1007_v34, 0.0  ;;  %v2303_v8 = vcvt.s32.f32 %v1972_v61 }
 0x185   : > { %v1012_v49 = vsub.f32 1.0, %v948_v42  ;;  %v947_v5 = vand.u32 2147483647, %v883_v41  ;;  %v1074_v7 = vmax.f32 %v1010_v43, 0.0  ;;  %v1009_v58 = vsub.f32 1.0, %v945_v4 }
 0x186   : > { %v888_v53 = vsub.f32 %v1990_v32, %v2303_v8  ;;  %v950_v28 = vand.u32 2147483647, %v886_v57  ;;  %1344 = vmatprep.subr.bf16.mxu0 %v1343_v39  ;;  %v1345_v9 = vpack.c.bf16 %v1071_v55, %v1069_v48  ;;  %v2304_v0 = vmov %v2302_v2 }
 0x187   : > { %v1076_v29 = vmax.f32 %v1012_v49, 0.0  ;;  %v1011_v16 = vsub.f32 1.0, %v947_v5  ;;  %v885_v19 = vsub.f32 %v1988_v33, %v2304_v0  ;;  %v1073_v46 = vmax.f32 %v1009_v58, 0.0 }
 0x188   : > { %v952_v24 = vand.u32 2147483647, %v888_v53  ;;  %v1014_v31 = vsub.f32 1.0, %v950_v28  ;;  %v2305_v40 = vmov %v2303_v8  ;;  %1346 = vmatpush1.bf16.msra.mxu0 %v1345_v9  ;;  %v2306_v13 = vcvt.s32.f32 %v1975_v3 }
 0x189   : > { %v887_v11 = vsub.f32 %v1988_v33, %v2305_v40  ;;  %v1347_v63 = vpack.c.bf16 %v1076_v29, %v1074_v7  ;;  %v1075_v17 = vmax.f32 %v1011_v16, 0.0  ;;  %v949_v18 = vand.u32 2147483647, %v885_v19 }
 0x18a   : > { %v890_v44 = vsub.f32 %v1990_v32, %v2306_v13  ;;  %v1016_v51 = vsub.f32 1.0, %v952_v24  ;;  %v1078_v59 = vmax.f32 %v1014_v31, 0.0  ;;  %v2307_v47 = vcvt.s32.f32 %v1978_v15 }
 0x18b   : > { %v951_v54 = vand.u32 2147483647, %v887_v11  ;;  %1348 = vmatprep.subr.bf16.mxu0 %v1347_v63  ;;  %v1349_v27 = vpack.c.bf16 %v1075_v17, %v1073_v46  ;;  %v1013_v61 = vsub.f32 1.0, %v949_v18  ;;  %v2308_v45 = vmov %v2306_v13 }
 0x18c   : > { %v892_v14 = vsub.f32 %v1990_v32, %v2307_v47  ;;  %v954_v26 = vand.u32 2147483647, %v890_v44  ;;  %v889_v60 = vsub.f32 %v1988_v33, %v2308_v45  ;;  %v1080_v25 = vmax.f32 %v1016_v51, 0.0 }
 0x18d   : > { %v1015_v22 = vsub.f32 1.0, %v951_v54  ;;  %v2309_v12 = vmov %v2307_v47  ;;  %1350 = vmatpush1.bf16.msra.mxu0 %v1349_v27  ;;  %v1077_v6 = vmax.f32 %v1013_v61, 0.0  ;;  %v1089_v42 = vsub.s32 0, %v1805_v52 }
 0x18e   : > { %v956_v23 = vand.u32 2147483647, %v892_v14  ;;  %v891_v21 = vsub.f32 %v1988_v33, %v2309_v12  ;;  %v1018_v50 = vsub.f32 1.0, %v954_v26  ;;  %v953_v20 = vand.u32 2147483647, %v889_v60 }
 0x18f   : > { %v1351_v32 = vpack.c.bf16 %v1080_v25, %v1078_v59  ;;  %v1079_v10 = vmax.f32 %v1015_v22, 0.0  ;;  %v1090_v41 = vrot.slane %v1814_v62, %v1089_v42  ;;  %v1535_v48 = vmov 1966171168  }
 0x190   : > { %v1020_v30 = vsub.f32 1.0, %v956_v23  ;;  %v955_v35 = vand.u32 2147483647, %v891_v21  ;;  %v1082_v37 = vmax.f32 %v1018_v50, 0.0  ;;  %v1017_v36 = vsub.f32 1.0, %v953_v20 }
 0x191   : > { %1352 = vmatprep.subr.bf16.mxu0 %v1351_v32  ;;  %v1353_v3 = vpack.c.bf16 %v1079_v10, %v1077_v6  ;;  %v1172_v43 = vunpack.c.l.s4 %v1535_v48  ;;  %v2310_v5 = vlaneseq }
 0x192   : > { %v1084_v1 = vmax.f32 %v1020_v30, 0.0  ;;  %v1019_v56 = vsub.f32 1.0, %v955_v35  ;;  %v1081_v34 = vmax.f32 %v1017_v36, 0.0 }
 0x193   : > { %1354 = vmatpush1.bf16.msra.mxu0 %v1353_v3  ;;  %v1173_v4 = vunpack.c.0.s8 %v1172_v43  ;;  %vm1188_vm1 = vcmp.lt.s32.totalorder %v2310_v5, 256 }
 0x194   : > { %v1355_v33 = vpack.c.bf16 %v1084_v1, %v1082_v37  ;;  %v1083_v15 = vmax.f32 %v1019_v56, 0.0 }
 0x195   : > { %v1176_v57 = vsub.s32 %v1173_v4, %v1805_v52 }
 0x196   : > { %1356 = vmatprep.subr.bf16.mxu0 %v1355_v33  ;;  %v1357_v38 = vpack.c.bf16 %v1083_v15, %v1081_v34 }
 0x198   : > { %1358 = vmatpush1.bf16.msra.mxu0 %v1357_v38 }
 0x19b   : > { %1162 = vmatmul.mubr.f32.vlgmr.msra.gmra.mrb[0].mxu0 %v1090_v41 }
 0x26e   : > { %v1163_v2 = vpop.f32.mrb[0].mxu0 }
 0x26f   : > { %v1165_v39 = vpop.f32.mrb[1].mxu0 }
 0x270   : > { %v1170_v55 = vcombine.low %v1163_v2, %v1165_v39 }
 0x272   : > { %v1177_v49 = vrot.slane %v1170_v55, %v1176_v57 }
 0x274   : > { %v1184_v62 = vrot.slane %v1177_v49, %v1176_v57 }
 0x276   : > { %1190 = vst.msk [vmem:[%s142_s22] sm:$0x3] %vm1188_vm1, %v1184_v62 }
 0x277   : > { %1475 = shalt.err (!%p1472_p1)
}
 0x278   : > { %s1476_s12 = scalar_lea.hbm %s2200_s26, 32  ;;  %s1480_s15 = scalar_lea.hbm %s2245_s3, 128 }
 0x279   : > { %p1477_p2 = scmp.ne.s32.totalorder %s2200_s26, %s1476_s12  ;;  %p1481_p10 = scmp.lt.u32.totalorder %s2200_s26, %s2245_s3 }
 0x27a   : > { %p1482_p0 = scmp.lt.u32.totalorder %s1480_s15, %s1476_s12  ;;  %p1484_p5 = scmp.lt.u32.totalorder %s1476_s12, %s2200_s26 }
 0x27b   : > { %p1478_p7 = pnand %p1477_p2, %p2311_p6 }
 0x27c   : > { %p1483_p4 = por %p1482_p0, %p1481_p10 }
 0x27d   : > { %p1479_p8 = pneg %p1478_p7 }
 0x27e   : > { %p1485_p12 = por %p1484_p5, %p1483_p4 }
 0x280   : > { %p1486_p3 = pnand %p1485_p12, %p1479_p8 }
 0x282   : > { %1489 = shalt.err (!%p1486_p3)
}
 0x283   : > { %1361 = dma.vmem_to_hbm [thread:$0]  (%p2311_p6), %s2202_s23, 32, %s2200_s26, %s1192_s30  }
 0x284 PF: > { %p1372_p9 = scmp.ge.s32.totalorder %s1530_s28, 2  ;;  %s1218_s9 = sand.u32 1, %s1518_s0  }
 0x285   : > { %p2312_p11 = scmp.ne.s32.totalorder %s2252_s11, 0  ;;  %s1219_s18 = scalar_lea.sflag [#allocation7], %s1218_s9 }
 0x287   : > { %p1368_p13 = pnand %p1372_p9, %p2312_p11 }
 0x289   : > { %1513 = dma.done.wait (!%p1368_p13), %s1219_s18, 32  }
 0x28a   : > { %1515 = vsyncadd (!%p1368_p13), %s1219_s18, 4294967264  ;;  %p24_p1 = scmp.ge.s32.totalorder %s1597_s4, 6   ;;  %s2313_s0 = smov %s1522_s1 }
 0x28b   : > { %s2314_s1 = smov %s1526_s27  ;;  %s2315_s27 = smov %s1609_s7 }
 0x28c   : > { %s2316_s28 = smov %s1597_s4  ;;  %26 = sbr.rel (!%p24_p1) target bundleno = 27 (0x1b), region = 69 }
 0x293   :  { %1224 = vsyncpa [#allocation6], 1 }
 0x294   :  { %1226 = vsyncpa [#allocation6 + $0x1], 1 }
 0x295   :  { %1227 = vsyncpa [#allocation7], 1 }
 0x296   :  { %1229 = vsyncpa [#allocation7 + $0x1], 1 }

</bundles_post_ra>
